<compile_context>
chip_gen: v7x
topology: tpu7x:2x2x1
jax: 0.10.0
libtpu: 0.0.40
codegen_flags: <defaults>
</compile_context>

<pallas_src>
import functools

import jax
import jax.numpy as jnp
from jax import lax
from jax.experimental import pallas as pl
from jax.experimental.pallas import tpu as pltpu


# ----------------------------------------------------------------------------
# fused cardinal_block kernel (one grid step == one batch item)
# ----------------------------------------------------------------------------
def _cardinal_kernel(x_ref, w_ref, o_ref, stage_ref, *,
                     H, W, C, base, n_tap,
                     off_conv, off_wsh, off_bsh, off_bf, off_wf):
    HW = H * W
    P = 3                                    # halo of the largest (7x7) kernel

    x = x_ref[0].astype(jnp.float32)         # (C, HW), lane-dense

    # Row validity is handled by zero halos: zero the stage buffer, then
    # overwrite the image lanes (done every step so each core's scratch is
    # initialised under "parallel" grid scheduling).
    stage_ref[...] = jnp.zeros_like(stage_ref)

    # Stage n_tap column-premasked copies of the image.  Copy k (horizontal
    # offset dx = k - P) is anchored at lane (base - k), so one read of all
    # n_tap*C rows at lane offset (base + dy*W - P) yields every horizontal tap
    # of kernel row dy simultaneously as a full-sublane block.
    col = lax.broadcasted_iota(jnp.int32, (1, HW), 1) % W       # source column
    for k in range(n_tap):
        dx = k - P
        if dx == 0:
            val = x
        else:
            valid = ((col - dx) >= 0) & ((col - dx) < W)
            val = jnp.where(valid, x, 0.0)
        a = base - k
        stage_ref[k * C:(k + 1) * C, a:a + HW] = val

    # Shared 7x7 im2col + stacked-branch contraction, accumulated per kernel
    # row:  y = bias_map + sum_ky  W[:, ky-block] @ stage_window(ky).
    y = w_ref[:, 0:HW].astype(jnp.float32)                      # (16, HW)
    kw = n_tap * C                                               # 32 rows / ky
    for ky in range(7):
        off = base + (ky - P) * W - P
        y = y + jnp.dot(
            w_ref[:, off_conv + ky * kw:off_conv + (ky + 1) * kw],
            stage_ref[:, off:off + HW],
            preferred_element_type=jnp.float32)

    x1 = y[0 * C:1 * C]                       # (C, HW) branch outputs
    x2 = y[1 * C:2 * C]
    x3 = y[2 * C:3 * C]

    # Attention: global average pool -> fc_share (eval-BN folded) -> ReLU ->
    # the three softmax heads stacked into one matmul.
    pooled = jnp.mean(x1 + x2 + x3, axis=1, keepdims=True)       # (C, 1)
    z = (jnp.dot(w_ref[:, off_wsh:off_wsh + C], pooled,
                 preferred_element_type=jnp.float32)
         + w_ref[:, off_bsh:off_bsh + 1])                        # (16, 1)
    h = jnp.maximum(z, 0.0)
    logits = (jnp.dot(w_ref[:, off_wf:off_wf + 16], h[0:16],
                      preferred_element_type=jnp.float32)
              + w_ref[:, off_bf:off_bf + 1])                     # (16, 1)

    def softmax_c(l):                                            # (C, 1)
        m = jnp.max(l, axis=0, keepdims=True)
        e = jnp.exp(l - m)
        return e / jnp.sum(e, axis=0, keepdims=True)

    a1 = softmax_c(logits[0 * C:1 * C])
    a2 = softmax_c(logits[1 * C:2 * C])
    a3 = softmax_c(logits[2 * C:3 * C])

    o_ref[0] = (a1 * x1 + a2 * x2 + a3 * x3).astype(o_ref.dtype)


# ----------------------------------------------------------------------------
# wrapper (NCHW in / NCHW out) — all weight algebra on the host, one pallas_call
# ----------------------------------------------------------------------------
def cardinal_block_pallas(x_nchw, params, eps=1e-5):
    B, C, H, W = x_nchw.shape
    HW = H * W
    P = 3                               # padding of the largest (7x7) kernel
    NTAP = 8                            # 7 horizontal taps + 1 zero-weight dummy
    KDIM = 7 * NTAP * C                 # shared im2col contraction width (224)
    f32 = jnp.float32

    x2d = x_nchw.reshape(B, C, HW)      # free view; spatial axis -> lanes

    # ---- fold conv1x1 into convKxK, embed in the shared 7x7(x8) tap layout ---
    def branch_weights(p, K):
        pad = K // 2
        w1 = p["w1"].reshape(C, C).astype(f32)
        b1 = p["b1"].reshape(C).astype(f32)
        wk = p["wk"].astype(f32)                                 # (C, C, K, K)
        bk = p["bk"].reshape(C).astype(f32)
        # folded per-tap weight: Wf[o,i,ky,kx] = sum_m wk[o,m,ky,kx] * w1[m,i]
        wf = jnp.einsum("omyx,mi->oiyx", wk, w1,
                        precision=lax.Precision.HIGHEST)
        wf7 = jnp.zeros((C, C, 7, 7), f32)
        wf7 = wf7.at[:, :, P - pad:P + pad + 1, P - pad:P + pad + 1].set(wf)
        wf8 = jnp.pad(wf7, ((0, 0), (0, 0), (0, 0), (0, NTAP - 7)))
        wbig = jnp.transpose(wf8, (0, 2, 3, 1)).reshape(C, KDIM)
        # per-pixel bias: KxK conv (zero padded) of the constant image b1, + bk
        img = jnp.broadcast_to(b1.reshape(1, C, 1, 1), (1, C, H, W)).astype(f32)
        bmap = lax.conv_general_dilated(
            img, wk, (1, 1), [(pad, pad), (pad, pad)],
            dimension_numbers=("NCHW", "OIHW", "NCHW"),
            precision=lax.Precision.HIGHEST)
        bmap = (bmap + bk.reshape(1, C, 1, 1)).reshape(C, HW)
        return wbig, bmap

    wb, bm = [], []
    for name, K in (("s1", 3), ("s2", 5), ("s3", 7)):
        a_, b_ = branch_weights(params[name], K)
        wb.append(a_)
        bm.append(b_)
    w_big = jnp.concatenate(wb, axis=0)                          # (3C, KDIM)
    bias_map = jnp.concatenate(bm, axis=0)                       # (3C, HW)

    # ---- attention: fold eval-mode BN into fc_share, stack the 3 heads ------
    att = params["att"]
    scale = att["gamma"] / jnp.sqrt(att["var"] + eps)
    wsh = (att["wsh"] * scale[:, None]).astype(f32)                       # (16, C)
    bsh = ((att["bsh"] - att["mean"]) * scale
           + att["beta"]).reshape(-1, 1).astype(f32)                      # (16, 1)
    wf_stack = jnp.concatenate([att["wf1"], att["wf2"], att["wf3"]],
                               axis=0).astype(f32)                        # (3C, 16)
    bf_stack = jnp.concatenate([att["bf1"], att["bf2"], att["bf3"]],
                               axis=0).reshape(-1, 1).astype(f32)         # (3C, 1)

    # ---- pack everything into one (R, SLAB) weight slab ---------------------
    R = max(16, -(-3 * C // 8) * 8)

    def pad_rows(m):
        return jnp.pad(m, ((0, R - m.shape[0]), (0, 0)))

    off_conv = HW
    off_wsh = off_conv + KDIM
    off_bsh = off_wsh + C
    off_bf = off_bsh + 1
    off_wf = off_bf + 1
    cols = off_wf + 16
    SLAB = -(-cols // 128) * 128
    w_slab = jnp.concatenate(
        [pad_rows(bias_map), pad_rows(w_big), pad_rows(wsh), pad_rows(bsh),
         pad_rows(bf_stack), pad_rows(wf_stack),
         jnp.zeros((R, SLAB - cols), f32)], axis=1)              # (R, SLAB)

    # ---- staging geometry: lane-128-aligned anchor with zero halos ----------
    base = max(128, -(-(P * W + P) // 128) * 128)
    SW = -(-(base + HW + P * W + P) // 128) * 128

    x_spec = pl.BlockSpec((1, C, HW), lambda b: (b, 0, 0))
    w_spec = pl.BlockSpec((R, SLAB), lambda b: (0, 0))

    kernel = functools.partial(
        _cardinal_kernel, H=H, W=W, C=C, base=base, n_tap=NTAP,
        off_conv=off_conv, off_wsh=off_wsh, off_bsh=off_bsh,
        off_bf=off_bf, off_wf=off_wf)

    out = pl.pallas_call(
        kernel,
        out_shape=jax.ShapeDtypeStruct((B, C, HW), x_nchw.dtype),
        grid_spec=pltpu.PrefetchScalarGridSpec(
            num_scalar_prefetch=0,
            grid=(B,),
            in_specs=[x_spec, w_spec],
            out_specs=x_spec,
            scratch_shapes=[pltpu.VMEM((NTAP * C, SW), f32)],    # staged taps
        ),
        compiler_params=pltpu.CompilerParams(
            dimension_semantics=("parallel",)),
    )(x2d, w_slab)
    return out.reshape(B, C, H, W)


# ----------------------------------------------------------------------------
# pure-JAX reference (for correctness check)
# ----------------------------------------------------------------------------
def _conv2d_nchw(x, w, b, pad):
    y = lax.conv_general_dilated(
        x, w, window_strides=(1, 1), padding=[(pad, pad), (pad, pad)],
        dimension_numbers=("NCHW", "OIHW", "NCHW"))
    return y + b.reshape(1, -1, 1, 1)


def cardinal_block_ref(x, params, eps=1e-5):
    def split(x, p, K):
        y = _conv2d_nchw(x, p["w1"], p["b1"], 0)
        return _conv2d_nchw(y, p["wk"], p["bk"], K // 2)

    x1 = split(x, params["s1"], 3)
    x2 = split(x, params["s2"], 5)
    x3 = split(x, params["s3"], 7)

    a = params["att"]
    s = x1 + x2 + x3
    pooled = jnp.mean(s, axis=(2, 3))                         # (B, C)
    z = pooled @ a["wsh"].T + a["bsh"]
    z = (z - a["mean"]) / jnp.sqrt(a["var"] + eps) * a["gamma"] + a["beta"]
    h = jax.nn.relu(z)
    a1 = jax.nn.softmax(h @ a["wf1"].T + a["bf1"], axis=1)
    a2 = jax.nn.softmax(h @ a["wf2"].T + a["bf2"], axis=1)
    a3 = jax.nn.softmax(h @ a["wf3"].T + a["bf3"], axis=1)
    return (a1[:, :, None, None] * x1 + a2[:, :, None, None] * x2
            + a3[:, :, None, None] * x3)


# ----------------------------------------------------------------------------
if __name__ == "__main__":
    key = jax.random.PRNGKey(0)
    B, C, H, W = 2, 4, 16, 16
    keys = jax.random.split(key, 25)

    def nrm(k, shape, scale=0.1):
        return scale * jax.random.normal(k, shape, jnp.float32)

    params = {
        "s1": dict(w1=nrm(keys[0], (C, C, 1, 1)), b1=nrm(keys[1], (C,)),
                   wk=nrm(keys[2], (C, C, 3, 3)), bk=nrm(keys[3], (C,))),
        "s2": dict(w1=nrm(keys[4], (C, C, 1, 1)), b1=nrm(keys[5], (C,)),
                   wk=nrm(keys[6], (C, C, 5, 5)), bk=nrm(keys[7], (C,))),
        "s3": dict(w1=nrm(keys[8], (C, C, 1, 1)), b1=nrm(keys[9], (C,)),
                   wk=nrm(keys[10], (C, C, 7, 7)), bk=nrm(keys[11], (C,))),
        "att": dict(
            wsh=nrm(keys[12], (16, C)), bsh=nrm(keys[13], (16,)),
            gamma=1.0 + nrm(keys[14], (16,)), beta=nrm(keys[15], (16,)),
            mean=jnp.zeros((16,), jnp.float32),
            var=jnp.ones((16,), jnp.float32),
            wf1=nrm(keys[16], (C, 16)), bf1=nrm(keys[17], (C,)),
            wf2=nrm(keys[18], (C, 16)), bf2=nrm(keys[19], (C,)),
            wf3=nrm(keys[20], (C, 16)), bf3=nrm(keys[21], (C,))),
    }

    x = jax.random.normal(keys[22], (B, C, H, W), jnp.float32)

    out = cardinal_block_pallas(x, params)
    out = jax.block_until_ready(out)

    ref = cardinal_block_ref(x, params)
    assert out.shape == (B, C, H, W)
    max_err = float(jnp.max(jnp.abs(out - ref)))
    assert jnp.allclose(out, ref, atol=1e-4, rtol=1e-4), max_err

    print("KERNEL_OK")
</pallas_src>

<mosaic_0001>
module attributes {stable_mosaic.version = 11 : i64} {
  func.func @_cardinal_kernel(%arg0: i32, %arg1: memref<1x4x256xf32, #tpu.memory_space<vmem>>, %arg2: memref<16x512xf32, #tpu.memory_space<vmem>>, %arg3: memref<1x4x256xf32, #tpu.memory_space<vmem>>, %arg4: memref<32x512xf32, #tpu.memory_space<vmem>>) attributes {dimension_semantics = [#tpu.dimension_semantics<parallel>], iteration_bounds = array<i64: 2>, scalar_prefetch = 0 : i64, scratch_operands = 1 : i64, tpu.core_type = #tpu.core_type<tc>, window_params = [{transform_indices = @transform_0, window_bounds = array<i64: 1, 4, 256>}, {pipeline_mode = #tpu.pipeline_mode<synchronous>, transform_indices = @transform_1, window_bounds = array<i64: 16, 512>}, {transform_indices = @transform_2, window_bounds = array<i64: 1, 4, 256>}]} {
    %c0 = arith.constant 0 : index
    %c0_0 = arith.constant 0 : index
    %c0_1 = arith.constant 0 : index
    %0 = vector.load %arg1[%c0, %c0_0, %c0_1] : memref<1x4x256xf32, #tpu.memory_space<vmem>>, vector<1x4x256xf32>
    %1 = vector.shape_cast %0 : vector<1x4x256xf32> to vector<4x256xf32>
    %cst = arith.constant 0.000000e+00 : f32
    %2 = vector.broadcast %cst : f32 to vector<32x512xf32>
    %c0_2 = arith.constant 0 : index
    %c0_3 = arith.constant 0 : index
    %3 = vector.load %arg4[%c0_2, %c0_3] : memref<32x512xf32, #tpu.memory_space<vmem>>, vector<32x512xf32>
    tpu.vector_store %arg4[%c0_2, %c0_3], %2 {strides = array<i32>} : memref<32x512xf32, #tpu.memory_space<vmem>>, vector<32x512xf32>,
    %4 = tpu.iota {dimensions = array<i32: 1>} : vector<1x256xi32>
    %c16_i32 = arith.constant 16 : i32
    %c0_i32 = arith.constant 0 : i32
    %5 = arith.cmpi eq, %c16_i32, %c0_i32 : i32
    %c1_i32 = arith.constant 1 : i32
    %6 = arith.select %5, %c1_i32, %c16_i32 : i32
    %7 = vector.broadcast %6 : i32 to vector<1x256xi32>
    %8 = arith.remsi %4, %7 : vector<1x256xi32>
    %c0_i32_4 = arith.constant 0 : i32
    %9 = vector.broadcast %c0_i32_4 : i32 to vector<1x256xi32>
    %10 = arith.cmpi ne, %8, %9 : vector<1x256xi32>
    %c0_i32_5 = arith.constant 0 : i32
    %11 = vector.broadcast %c0_i32_5 : i32 to vector<1x256xi32>
    %12 = arith.cmpi slt, %8, %11 : vector<1x256xi32>
    %c0_i32_6 = arith.constant 0 : i32
    %13 = arith.cmpi slt, %6, %c0_i32_6 : i32
    %14 = vector.broadcast %13 : i1 to vector<1x256xi1>
    %15 = vector.broadcast %14 : vector<1x256xi1> to vector<1x256xi1>
    %16 = arith.xori %12, %15 : vector<1x256xi1>
    %17 = arith.andi %16, %10 : vector<1x256xi1>
    %18 = vector.broadcast %6 : i32 to vector<1x256xi32>
    %19 = arith.addi %8, %18 : vector<1x256xi32>
    %20 = arith.select %17, %19, %8 : vector<1x256xi1>, vector<1x256xi32>
    %c-3_i32 = arith.constant -3 : i32
    %21 = vector.broadcast %c-3_i32 : i32 to vector<1x256xi32>
    %22 = arith.subi %20, %21 : vector<1x256xi32>
    %c0_i32_7 = arith.constant 0 : i32
    %23 = vector.broadcast %c0_i32_7 : i32 to vector<1x256xi32>
    %24 = arith.cmpi sge, %22, %23 : vector<1x256xi32>
    %c-3_i32_8 = arith.constant -3 : i32
    %25 = vector.broadcast %c-3_i32_8 : i32 to vector<1x256xi32>
    %26 = arith.subi %20, %25 : vector<1x256xi32>
    %c16_i32_9 = arith.constant 16 : i32
    %27 = vector.broadcast %c16_i32_9 : i32 to vector<1x256xi32>
    %28 = arith.cmpi slt, %26, %27 : vector<1x256xi32>
    %29 = arith.andi %24, %28 : vector<1x256xi1>
    %cst_10 = arith.constant 0.000000e+00 : f32
    %30 = vector.shape_cast %29 : vector<1x256xi1> to vector<1x256xi1>
    %31 = vector.broadcast %30 : vector<1x256xi1> to vector<4x256xi1>
    %32 = vector.broadcast %cst_10 : f32 to vector<4x256xf32>
    %33 = arith.select %31, %1, %32 : vector<4x256xi1>, vector<4x256xf32>
    %c0_11 = arith.constant 0 : index
    %c128 = arith.constant 128 : index
    %34 = vector.load %arg4[%c0_11, %c128] : memref<32x512xf32, #tpu.memory_space<vmem>>, vector<4x256xf32>
    tpu.vector_store %arg4[%c0_11, %c128], %33 {strides = array<i32>} : memref<32x512xf32, #tpu.memory_space<vmem>>, vector<4x256xf32>,
    %c-2_i32 = arith.constant -2 : i32
    %35 = vector.broadcast %c-2_i32 : i32 to vector<1x256xi32>
    %36 = arith.subi %20, %35 : vector<1x256xi32>
    %c0_i32_12 = arith.constant 0 : i32
    %37 = vector.broadcast %c0_i32_12 : i32 to vector<1x256xi32>
    %38 = arith.cmpi sge, %36, %37 : vector<1x256xi32>
    %c-2_i32_13 = arith.constant -2 : i32
    %39 = vector.broadcast %c-2_i32_13 : i32 to vector<1x256xi32>
    %40 = arith.subi %20, %39 : vector<1x256xi32>
    %c16_i32_14 = arith.constant 16 : i32
    %41 = vector.broadcast %c16_i32_14 : i32 to vector<1x256xi32>
    %42 = arith.cmpi slt, %40, %41 : vector<1x256xi32>
    %43 = arith.andi %38, %42 : vector<1x256xi1>
    %cst_15 = arith.constant 0.000000e+00 : f32
    %44 = vector.shape_cast %43 : vector<1x256xi1> to vector<1x256xi1>
    %45 = vector.broadcast %44 : vector<1x256xi1> to vector<4x256xi1>
    %46 = vector.broadcast %cst_15 : f32 to vector<4x256xf32>
    %47 = arith.select %45, %1, %46 : vector<4x256xi1>, vector<4x256xf32>
    %c4 = arith.constant 4 : index
    %c127 = arith.constant 127 : index
    %48 = vector.load %arg4[%c4, %c127] : memref<32x512xf32, #tpu.memory_space<vmem>>, vector<4x256xf32>
    tpu.vector_store %arg4[%c4, %c127], %47 {strides = array<i32>} : memref<32x512xf32, #tpu.memory_space<vmem>>, vector<4x256xf32>,
    %c-1_i32 = arith.constant -1 : i32
    %49 = vector.broadcast %c-1_i32 : i32 to vector<1x256xi32>
    %50 = arith.subi %20, %49 : vector<1x256xi32>
    %c0_i32_16 = arith.constant 0 : i32
    %51 = vector.broadcast %c0_i32_16 : i32 to vector<1x256xi32>
    %52 = arith.cmpi sge, %50, %51 : vector<1x256xi32>
    %c-1_i32_17 = arith.constant -1 : i32
    %53 = vector.broadcast %c-1_i32_17 : i32 to vector<1x256xi32>
    %54 = arith.subi %20, %53 : vector<1x256xi32>
    %c16_i32_18 = arith.constant 16 : i32
    %55 = vector.broadcast %c16_i32_18 : i32 to vector<1x256xi32>
    %56 = arith.cmpi slt, %54, %55 : vector<1x256xi32>
    %57 = arith.andi %52, %56 : vector<1x256xi1>
    %cst_19 = arith.constant 0.000000e+00 : f32
    %58 = vector.shape_cast %57 : vector<1x256xi1> to vector<1x256xi1>
    %59 = vector.broadcast %58 : vector<1x256xi1> to vector<4x256xi1>
    %60 = vector.broadcast %cst_19 : f32 to vector<4x256xf32>
    %61 = arith.select %59, %1, %60 : vector<4x256xi1>, vector<4x256xf32>
    %c8 = arith.constant 8 : index
    %c126 = arith.constant 126 : index
    %62 = vector.load %arg4[%c8, %c126] : memref<32x512xf32, #tpu.memory_space<vmem>>, vector<4x256xf32>
    tpu.vector_store %arg4[%c8, %c126], %61 {strides = array<i32>} : memref<32x512xf32, #tpu.memory_space<vmem>>, vector<4x256xf32>,
    %c12 = arith.constant 12 : index
    %c125 = arith.constant 125 : index
    %63 = vector.load %arg4[%c12, %c125] : memref<32x512xf32, #tpu.memory_space<vmem>>, vector<4x256xf32>
    tpu.vector_store %arg4[%c12, %c125], %1 {strides = array<i32>} : memref<32x512xf32, #tpu.memory_space<vmem>>, vector<4x256xf32>,
    %c1_i32_20 = arith.constant 1 : i32
    %64 = vector.broadcast %c1_i32_20 : i32 to vector<1x256xi32>
    %65 = arith.subi %20, %64 : vector<1x256xi32>
    %c0_i32_21 = arith.constant 0 : i32
    %66 = vector.broadcast %c0_i32_21 : i32 to vector<1x256xi32>
    %67 = arith.cmpi sge, %65, %66 : vector<1x256xi32>
    %c1_i32_22 = arith.constant 1 : i32
    %68 = vector.broadcast %c1_i32_22 : i32 to vector<1x256xi32>
    %69 = arith.subi %20, %68 : vector<1x256xi32>
    %c16_i32_23 = arith.constant 16 : i32
    %70 = vector.broadcast %c16_i32_23 : i32 to vector<1x256xi32>
    %71 = arith.cmpi slt, %69, %70 : vector<1x256xi32>
    %72 = arith.andi %67, %71 : vector<1x256xi1>
    %cst_24 = arith.constant 0.000000e+00 : f32
    %73 = vector.shape_cast %72 : vector<1x256xi1> to vector<1x256xi1>
    %74 = vector.broadcast %73 : vector<1x256xi1> to vector<4x256xi1>
    %75 = vector.broadcast %cst_24 : f32 to vector<4x256xf32>
    %76 = arith.select %74, %1, %75 : vector<4x256xi1>, vector<4x256xf32>
    %c16 = arith.constant 16 : index
    %c124 = arith.constant 124 : index
    %77 = vector.load %arg4[%c16, %c124] : memref<32x512xf32, #tpu.memory_space<vmem>>, vector<4x256xf32>
    tpu.vector_store %arg4[%c16, %c124], %76 {strides = array<i32>} : memref<32x512xf32, #tpu.memory_space<vmem>>, vector<4x256xf32>,
    %c2_i32 = arith.constant 2 : i32
    %78 = vector.broadcast %c2_i32 : i32 to vector<1x256xi32>
    %79 = arith.subi %20, %78 : vector<1x256xi32>
    %c0_i32_25 = arith.constant 0 : i32
    %80 = vector.broadcast %c0_i32_25 : i32 to vector<1x256xi32>
    %81 = arith.cmpi sge, %79, %80 : vector<1x256xi32>
    %c2_i32_26 = arith.constant 2 : i32
    %82 = vector.broadcast %c2_i32_26 : i32 to vector<1x256xi32>
    %83 = arith.subi %20, %82 : vector<1x256xi32>
    %c16_i32_27 = arith.constant 16 : i32
    %84 = vector.broadcast %c16_i32_27 : i32 to vector<1x256xi32>
    %85 = arith.cmpi slt, %83, %84 : vector<1x256xi32>
    %86 = arith.andi %81, %85 : vector<1x256xi1>
    %cst_28 = arith.constant 0.000000e+00 : f32
    %87 = vector.shape_cast %86 : vector<1x256xi1> to vector<1x256xi1>
    %88 = vector.broadcast %87 : vector<1x256xi1> to vector<4x256xi1>
    %89 = vector.broadcast %cst_28 : f32 to vector<4x256xf32>
    %90 = arith.select %88, %1, %89 : vector<4x256xi1>, vector<4x256xf32>
    %c20 = arith.constant 20 : index
    %c123 = arith.constant 123 : index
    %91 = vector.load %arg4[%c20, %c123] : memref<32x512xf32, #tpu.memory_space<vmem>>, vector<4x256xf32>
    tpu.vector_store %arg4[%c20, %c123], %90 {strides = array<i32>} : memref<32x512xf32, #tpu.memory_space<vmem>>, vector<4x256xf32>,
    %c3_i32 = arith.constant 3 : i32
    %92 = vector.broadcast %c3_i32 : i32 to vector<1x256xi32>
    %93 = arith.subi %20, %92 : vector<1x256xi32>
    %c0_i32_29 = arith.constant 0 : i32
    %94 = vector.broadcast %c0_i32_29 : i32 to vector<1x256xi32>
    %95 = arith.cmpi sge, %93, %94 : vector<1x256xi32>
    %c3_i32_30 = arith.constant 3 : i32
    %96 = vector.broadcast %c3_i32_30 : i32 to vector<1x256xi32>
    %97 = arith.subi %20, %96 : vector<1x256xi32>
    %c16_i32_31 = arith.constant 16 : i32
    %98 = vector.broadcast %c16_i32_31 : i32 to vector<1x256xi32>
    %99 = arith.cmpi slt, %97, %98 : vector<1x256xi32>
    %100 = arith.andi %95, %99 : vector<1x256xi1>
    %cst_32 = arith.constant 0.000000e+00 : f32
    %101 = vector.shape_cast %100 : vector<1x256xi1> to vector<1x256xi1>
    %102 = vector.broadcast %101 : vector<1x256xi1> to vector<4x256xi1>
    %103 = vector.broadcast %cst_32 : f32 to vector<4x256xf32>
    %104 = arith.select %102, %1, %103 : vector<4x256xi1>, vector<4x256xf32>
    %c24 = arith.constant 24 : index
    %c122 = arith.constant 122 : index
    %105 = vector.load %arg4[%c24, %c122] : memref<32x512xf32, #tpu.memory_space<vmem>>, vector<4x256xf32>
    tpu.vector_store %arg4[%c24, %c122], %104 {strides = array<i32>} : memref<32x512xf32, #tpu.memory_space<vmem>>, vector<4x256xf32>,
    %c4_i32 = arith.constant 4 : i32
    %106 = vector.broadcast %c4_i32 : i32 to vector<1x256xi32>
    %107 = arith.subi %20, %106 : vector<1x256xi32>
    %c0_i32_33 = arith.constant 0 : i32
    %108 = vector.broadcast %c0_i32_33 : i32 to vector<1x256xi32>
    %109 = arith.cmpi sge, %107, %108 : vector<1x256xi32>
    %c4_i32_34 = arith.constant 4 : i32
    %110 = vector.broadcast %c4_i32_34 : i32 to vector<1x256xi32>
    %111 = arith.subi %20, %110 : vector<1x256xi32>
    %c16_i32_35 = arith.constant 16 : i32
    %112 = vector.broadcast %c16_i32_35 : i32 to vector<1x256xi32>
    %113 = arith.cmpi slt, %111, %112 : vector<1x256xi32>
    %114 = arith.andi %109, %113 : vector<1x256xi1>
    %cst_36 = arith.constant 0.000000e+00 : f32
    %115 = vector.shape_cast %114 : vector<1x256xi1> to vector<1x256xi1>
    %116 = vector.broadcast %115 : vector<1x256xi1> to vector<4x256xi1>
    %117 = vector.broadcast %cst_36 : f32 to vector<4x256xf32>
    %118 = arith.select %116, %1, %117 : vector<4x256xi1>, vector<4x256xf32>
    %c28 = arith.constant 28 : index
    %c121 = arith.constant 121 : index
    %119 = vector.load %arg4[%c28, %c121] : memref<32x512xf32, #tpu.memory_space<vmem>>, vector<4x256xf32>
    tpu.vector_store %arg4[%c28, %c121], %118 {strides = array<i32>} : memref<32x512xf32, #tpu.memory_space<vmem>>, vector<4x256xf32>,
    %c0_37 = arith.constant 0 : index
    %c0_38 = arith.constant 0 : index
    %120 = vector.load %arg2[%c0_37, %c0_38] : memref<16x512xf32, #tpu.memory_space<vmem>>, vector<16x256xf32>
    %c0_39 = arith.constant 0 : index
    %c256 = arith.constant 256 : index
    %121 = vector.load %arg2[%c0_39, %c256] : memref<16x512xf32, #tpu.memory_space<vmem>>, vector<16x32xf32>
    %c0_40 = arith.constant 0 : index
    %c77 = arith.constant 77 : index
    %122 = vector.load %arg4[%c0_40, %c77] : memref<32x512xf32, #tpu.memory_space<vmem>>, vector<32x256xf32>
    %cst_41 = arith.constant dense<0.000000e+00> : vector<16x256xf32>
    %123 = tpu.matmul %121, %122, %cst_41 {dimension_numbers = #tpu.dot_dimension_numbers<[1], [0], [0], [1], [0, 0, 1, 1], [], []>} : vector<16x32xf32>, vector<32x256xf32>, vector<16x256xf32> -> vector<16x256xf32>
    %124 = arith.addf %120, %123 : vector<16x256xf32>
    %c0_42 = arith.constant 0 : index
    %c288 = arith.constant 288 : index
    %125 = vector.load %arg2[%c0_42, %c288] : memref<16x512xf32, #tpu.memory_space<vmem>>, vector<16x32xf32>
    %c0_43 = arith.constant 0 : index
    %c93 = arith.constant 93 : index
    %126 = vector.load %arg4[%c0_43, %c93] : memref<32x512xf32, #tpu.memory_space<vmem>>, vector<32x256xf32>
    %cst_44 = arith.constant dense<0.000000e+00> : vector<16x256xf32>
    %127 = tpu.matmul %125, %126, %cst_44 {dimension_numbers = #tpu.dot_dimension_numbers<[1], [0], [0], [1], [0, 0, 1, 1], [], []>} : vector<16x32xf32>, vector<32x256xf32>, vector<16x256xf32> -> vector<16x256xf32>
    %128 = arith.addf %124, %127 : vector<16x256xf32>
    %c0_45 = arith.constant 0 : index
    %c320 = arith.constant 320 : index
    %129 = vector.load %arg2[%c0_45, %c320] : memref<16x512xf32, #tpu.memory_space<vmem>>, vector<16x32xf32>
    %c0_46 = arith.constant 0 : index
    %c109 = arith.constant 109 : index
    %130 = vector.load %arg4[%c0_46, %c109] : memref<32x512xf32, #tpu.memory_space<vmem>>, vector<32x256xf32>
    %cst_47 = arith.constant dense<0.000000e+00> : vector<16x256xf32>
    %131 = tpu.matmul %129, %130, %cst_47 {dimension_numbers = #tpu.dot_dimension_numbers<[1], [0], [0], [1], [0, 0, 1, 1], [], []>} : vector<16x32xf32>, vector<32x256xf32>, vector<16x256xf32> -> vector<16x256xf32>
    %132 = arith.addf %128, %131 : vector<16x256xf32>
    %c0_48 = arith.constant 0 : index
    %c352 = arith.constant 352 : index
    %133 = vector.load %arg2[%c0_48, %c352] : memref<16x512xf32, #tpu.memory_space<vmem>>, vector<16x32xf32>
    %c0_49 = arith.constant 0 : index
    %c125_50 = arith.constant 125 : index
    %134 = vector.load %arg4[%c0_49, %c125_50] : memref<32x512xf32, #tpu.memory_space<vmem>>, vector<32x256xf32>
    %cst_51 = arith.constant dense<0.000000e+00> : vector<16x256xf32>
    %135 = tpu.matmul %133, %134, %cst_51 {dimension_numbers = #tpu.dot_dimension_numbers<[1], [0], [0], [1], [0, 0, 1, 1], [], []>} : vector<16x32xf32>, vector<32x256xf32>, vector<16x256xf32> -> vector<16x256xf32>
    %136 = arith.addf %132, %135 : vector<16x256xf32>
    %c0_52 = arith.constant 0 : index
    %c384 = arith.constant 384 : index
    %137 = vector.load %arg2[%c0_52, %c384] : memref<16x512xf32, #tpu.memory_space<vmem>>, vector<16x32xf32>
    %c0_53 = arith.constant 0 : index
    %c141 = arith.constant 141 : index
    %138 = vector.load %arg4[%c0_53, %c141] : memref<32x512xf32, #tpu.memory_space<vmem>>, vector<32x256xf32>
    %cst_54 = arith.constant dense<0.000000e+00> : vector<16x256xf32>
    %139 = tpu.matmul %137, %138, %cst_54 {dimension_numbers = #tpu.dot_dimension_numbers<[1], [0], [0], [1], [0, 0, 1, 1], [], []>} : vector<16x32xf32>, vector<32x256xf32>, vector<16x256xf32> -> vector<16x256xf32>
    %140 = arith.addf %136, %139 : vector<16x256xf32>
    %c0_55 = arith.constant 0 : index
    %c416 = arith.constant 416 : index
    %141 = vector.load %arg2[%c0_55, %c416] : memref<16x512xf32, #tpu.memory_space<vmem>>, vector<16x32xf32>
    %c0_56 = arith.constant 0 : index
    %c157 = arith.constant 157 : index
    %142 = vector.load %arg4[%c0_56, %c157] : memref<32x512xf32, #tpu.memory_space<vmem>>, vector<32x256xf32>
    %cst_57 = arith.constant dense<0.000000e+00> : vector<16x256xf32>
    %143 = tpu.matmul %141, %142, %cst_57 {dimension_numbers = #tpu.dot_dimension_numbers<[1], [0], [0], [1], [0, 0, 1, 1], [], []>} : vector<16x32xf32>, vector<32x256xf32>, vector<16x256xf32> -> vector<16x256xf32>
    %144 = arith.addf %140, %143 : vector<16x256xf32>
    %c0_58 = arith.constant 0 : index
    %c448 = arith.constant 448 : index
    %145 = vector.load %arg2[%c0_58, %c448] : memref<16x512xf32, #tpu.memory_space<vmem>>, vector<16x32xf32>
    %c0_59 = arith.constant 0 : index
    %c173 = arith.constant 173 : index
    %146 = vector.load %arg4[%c0_59, %c173] : memref<32x512xf32, #tpu.memory_space<vmem>>, vector<32x256xf32>
    %cst_60 = arith.constant dense<0.000000e+00> : vector<16x256xf32>
    %147 = tpu.matmul %145, %146, %cst_60 {dimension_numbers = #tpu.dot_dimension_numbers<[1], [0], [0], [1], [0, 0, 1, 1], [], []>} : vector<16x32xf32>, vector<32x256xf32>, vector<16x256xf32> -> vector<16x256xf32>
    %148 = arith.addf %144, %147 : vector<16x256xf32>
    %149 = vector.extract_strided_slice %148 {offsets = [0, 0], sizes = [4, 256], strides = [1, 1]} : vector<16x256xf32> to vector<4x256xf32>
    %150 = vector.extract_strided_slice %148 {offsets = [4, 0], sizes = [4, 256], strides = [1, 1]} : vector<16x256xf32> to vector<4x256xf32>
    %151 = vector.extract_strided_slice %148 {offsets = [8, 0], sizes = [4, 256], strides = [1, 1]} : vector<16x256xf32> to vector<4x256xf32>
    %152 = arith.addf %149, %150 : vector<4x256xf32>
    %153 = arith.addf %152, %151 : vector<4x256xf32>
    %cst_61 = arith.constant dense<0.000000e+00> : vector<4xf32>
    %154 = vector.multi_reduction <add>, %153, %cst_61 [1] : vector<4x256xf32> to vector<4xf32>
    %155 = vector.shape_cast %154 : vector<4xf32> to vector<4x1xf32>
    %cst_62 = arith.constant 2.560000e+02 : f32
    %156 = vector.broadcast %cst_62 : f32 to vector<4x1xf32>
    %157 = arith.divf %155, %156 : vector<4x1xf32>
    %c0_63 = arith.constant 0 : index
    %c480 = arith.constant 480 : index
    %158 = vector.load %arg2[%c0_63, %c480] : memref<16x512xf32, #tpu.memory_space<vmem>>, vector<16x4xf32>
    %cst_64 = arith.constant dense<0.000000e+00> : vector<16x1xf32>
    %159 = tpu.matmul %158, %157, %cst_64 {dimension_numbers = #tpu.dot_dimension_numbers<[1], [0], [0], [1], [0, 0, 1, 1], [], []>} : vector<16x4xf32>, vector<4x1xf32>, vector<16x1xf32> -> vector<16x1xf32>
    %c0_65 = arith.constant 0 : index
    %c484 = arith.constant 484 : index
    %160 = vector.load %arg2[%c0_65, %c484] : memref<16x512xf32, #tpu.memory_space<vmem>>, vector<16x1xf32>
    %161 = arith.addf %159, %160 : vector<16x1xf32>
    %cst_66 = arith.constant 0.000000e+00 : f32
    %162 = vector.broadcast %cst_66 : f32 to vector<16x1xf32>
    %163 = arith.maximumf %161, %162 : vector<16x1xf32>
    %c0_67 = arith.constant 0 : index
    %c486 = arith.constant 486 : index
    %164 = vector.load %arg2[%c0_67, %c486] : memref<16x512xf32, #tpu.memory_space<vmem>>, vector<16x16xf32>
    %cst_68 = arith.constant dense<0.000000e+00> : vector<16x1xf32>
    %165 = tpu.matmul %164, %163, %cst_68 {dimension_numbers = #tpu.dot_dimension_numbers<[1], [0], [0], [1], [0, 0, 1, 1], [], []>} : vector<16x16xf32>, vector<16x1xf32>, vector<16x1xf32> -> vector<16x1xf32>
    %c0_69 = arith.constant 0 : index
    %c485 = arith.constant 485 : index
    %166 = vector.load %arg2[%c0_69, %c485] : memref<16x512xf32, #tpu.memory_space<vmem>>, vector<16x1xf32>
    %167 = arith.addf %165, %166 : vector<16x1xf32>
    %168 = vector.extract_strided_slice %167 {offsets = [0, 0], sizes = [4, 1], strides = [1, 1]} : vector<16x1xf32> to vector<4x1xf32>
    %cst_70 = arith.constant dense<0xFF800000> : vector<1xf32>
    %169 = vector.multi_reduction <maximumf>, %168, %cst_70 [0] : vector<4x1xf32> to vector<1xf32>
    %170 = vector.shape_cast %169 : vector<1xf32> to vector<1x1xf32>
    %171 = vector.broadcast %170 : vector<1x1xf32> to vector<4x1xf32>
    %172 = arith.subf %168, %171 : vector<4x1xf32>
    %173 = math.exp %172 : vector<4x1xf32>
    %cst_71 = arith.constant dense<0.000000e+00> : vector<1xf32>
    %174 = vector.multi_reduction <add>, %173, %cst_71 [0] : vector<4x1xf32> to vector<1xf32>
    %175 = vector.shape_cast %174 : vector<1xf32> to vector<1x1xf32>
    %176 = vector.broadcast %175 : vector<1x1xf32> to vector<4x1xf32>
    %177 = arith.divf %173, %176 : vector<4x1xf32>
    %178 = vector.extract_strided_slice %167 {offsets = [4, 0], sizes = [4, 1], strides = [1, 1]} : vector<16x1xf32> to vector<4x1xf32>
    %cst_72 = arith.constant dense<0xFF800000> : vector<1xf32>
    %179 = vector.multi_reduction <maximumf>, %178, %cst_72 [0] : vector<4x1xf32> to vector<1xf32>
    %180 = vector.shape_cast %179 : vector<1xf32> to vector<1x1xf32>
    %181 = vector.broadcast %180 : vector<1x1xf32> to vector<4x1xf32>
    %182 = arith.subf %178, %181 : vector<4x1xf32>
    %183 = math.exp %182 : vector<4x1xf32>
    %cst_73 = arith.constant dense<0.000000e+00> : vector<1xf32>
    %184 = vector.multi_reduction <add>, %183, %cst_73 [0] : vector<4x1xf32> to vector<1xf32>
    %185 = vector.shape_cast %184 : vector<1xf32> to vector<1x1xf32>
    %186 = vector.broadcast %185 : vector<1x1xf32> to vector<4x1xf32>
    %187 = arith.divf %183, %186 : vector<4x1xf32>
    %188 = vector.extract_strided_slice %167 {offsets = [8, 0], sizes = [4, 1], strides = [1, 1]} : vector<16x1xf32> to vector<4x1xf32>
    %cst_74 = arith.constant dense<0xFF800000> : vector<1xf32>
    %189 = vector.multi_reduction <maximumf>, %188, %cst_74 [0] : vector<4x1xf32> to vector<1xf32>
    %190 = vector.shape_cast %189 : vector<1xf32> to vector<1x1xf32>
    %191 = vector.broadcast %190 : vector<1x1xf32> to vector<4x1xf32>
    %192 = arith.subf %188, %191 : vector<4x1xf32>
    %193 = math.exp %192 : vector<4x1xf32>
    %cst_75 = arith.constant dense<0.000000e+00> : vector<1xf32>
    %194 = vector.multi_reduction <add>, %193, %cst_75 [0] : vector<4x1xf32> to vector<1xf32>
    %195 = vector.shape_cast %194 : vector<1xf32> to vector<1x1xf32>
    %196 = vector.broadcast %195 : vector<1x1xf32> to vector<4x1xf32>
    %197 = arith.divf %193, %196 : vector<4x1xf32>
    %198 = vector.broadcast %177 : vector<4x1xf32> to vector<4x256xf32>
    %199 = arith.mulf %198, %149 : vector<4x256xf32>
    %200 = vector.broadcast %187 : vector<4x1xf32> to vector<4x256xf32>
    %201 = arith.mulf %200, %150 : vector<4x256xf32>
    %202 = arith.addf %199, %201 : vector<4x256xf32>
    %203 = vector.broadcast %197 : vector<4x1xf32> to vector<4x256xf32>
    %204 = arith.mulf %203, %151 : vector<4x256xf32>
    %205 = arith.addf %202, %204 : vector<4x256xf32>
    %c0_76 = arith.constant 0 : index
    %c0_77 = arith.constant 0 : index
    %c0_78 = arith.constant 0 : index
    %206 = vector.load %arg3[%c0_76, %c0_77, %c0_78] : memref<1x4x256xf32, #tpu.memory_space<vmem>>, vector<1x4x256xf32>
    %207 = vector.shape_cast %206 : vector<1x4x256xf32> to vector<4x256xf32>
    %208 = vector.shape_cast %205 : vector<4x256xf32> to vector<1x4x256xf32>
    tpu.vector_store %arg3[%c0_76, %c0_77, %c0_78], %208 {strides = array<i32>} : memref<1x4x256xf32, #tpu.memory_space<vmem>>, vector<1x4x256xf32>,
    return
  }
  func.func @transform_0(%arg0: i32) -> (i32, i32, i32) {
    %c0_i32 = arith.constant 0 : i32
    %c0_i32_0 = arith.constant 0 : i32
    %c0_i32_1 = arith.constant 0 : i32
    return %arg0, %c0_i32, %c0_i32_0 : i32, i32, i32
  }
  func.func @transform_1(%arg0: i32) -> (i32, i32) {
    %c0_i32 = arith.constant 0 : i32
    %c0_i32_0 = arith.constant 0 : i32
    %c0_i32_1 = arith.constant 0 : i32
    return %c0_i32, %c0_i32_0 : i32, i32
  }
  func.func @transform_2(%arg0: i32) -> (i32, i32, i32) {
    %c0_i32 = arith.constant 0 : i32
    %c0_i32_0 = arith.constant 0 : i32
    %c0_i32_1 = arith.constant 0 : i32
    return %arg0, %c0_i32, %c0_i32_0 : i32, i32, i32
  }
}

</mosaic_0001>

<bundles_post_ra>
// kernel: tpu_custom_call.1
= control target key start
LH: loop header
LB: loop body
LE: loop exit
PB: predicated region body
PF: predicated region fallthrough
CT: control target
= control target key end

     0   :  { %7 = vsyncpa [#allocation4], 0  ;;  %s2987_s0 = inlined_call_operand.hbm [shape: f32[2,4,256], index: 0, kind: input, shape index: {}]   ;;  %s2988_s1 = inlined_call_operand.hbm [shape: f32[16,512], index: 1, kind: input, shape index: {}]   ;;  %s2989_s2 = inlined_call_operand.hbm [shape: f32[2,4,256], index: 2, kind: output, shape index: {}]  }
   0x1   :  { %9 = vsyncpa [#allocation4 + $0x1], 0 }
   0x2   :  { %10 = vsyncpa [#allocation7], 0 }
   0x3   :  { %11 = vsyncpa [#allocation5], 0 }
   0x4   :  { %13 = vsyncpa [#allocation5 + $0x1], 0  ;;  %s2436_s9 = smov 0   ;;  %s2438_s10 = smov 0  }
   0x5   :  { %s2440_s11 = smov 0   ;;  %s2442_s12 = smov 0  }
   0x6 LB: > { %s2457_s13 = sadd.s32 4294967295, %s2392_s12   ;;  %s1798_s14 = sadd.s32 4294967294, %s2392_s12   ;;  %s2392_s12 = sphi %s2442_s12, %s3009_s12   ;;  %s2388_s11 = sphi %s2440_s11, %s3008_s11   ;;  %s2384_s10 = sphi %s2438_s10, %s3007_s10   ;;  %s2380_s9 = sphi %s2436_s9, %s3006_s9  }
   0x7   : > { %p39_p0 = scmp.ne.s32.totalorder %s2384_s10, %s2380_s9  ;;  %p2990_p1 = scmp.eq.s32.totalorder %s2457_s13, 0 }
   0x8   : > { %p90_p3 = scmp.eq.s32.totalorder %s1798_s14, 1  ;;  %p1799_p5 = scmp.ge.s32.totalorder %s2392_s12, 1 }
   0x9   : > { %p2466_p4 = por %p2990_p1, %p39_p0  ;;  %p97_p7 = scmp.lt.s32.totalorder %s2392_s12, 3 }
   0xa   : > { %p2471_p6 = por %p90_p3, %p39_p0  ;;  %s2394_s18 = smov [#allocation6]  }
   0xb   : > { %s2993_s15 = scalar_select %p2466_p4, 1, 0 }
   0xc   : > { %s2994_s16 = scalar_select %p2471_p6, 1, 0 }
   0xd   : > { %p2476_p8 = pnand %p1799_p5, %p97_p7  ;;  %s109_s19 = sshll.u32 %s2394_s18, 4  ;;  %s2480_s19 = int_to_ptr.vmem [resolvable:$true] %s109_s19 }
   0xe   : > { %s2492_s21 = sadd.s32 1, %s2392_s12   ;;  %s26_s22 = sadd.s32 1, %s2388_s11 }
   0xf   : > { %s2995_s17 = scalar_select %p2476_p8, 1, 0 }
  0x10   : > { %p1964_p9 = pneg %p2476_p8  ;;  %s23_s23 = ssub.s32 %s2392_s12, %s2492_s21 }
  0x11   : > { %s2264_s26 = scalar_lea.hbm %s2988_s1, 1024 }
  0x12   : > { %p2487_p11 = pnand %p1964_p9, %p2990_p1  ;;  %p2265_p12 = scmp.ne.s32.totalorder %s2988_s1, %s2264_s26 }
  0x13   : > { %p2271_p5 = scmp.lt.u32.totalorder %s2264_s26, %s2988_s1 }
  0x14   : > { %p2266_p13 = pneg %p2487_p11 }
  0x16   : > { %p2267_p0 = pnand %p2266_p13, %p2265_p12 }
  0x18   : > { %p2268_p3 = pneg %p2267_p0 }
  0x1a   : > { %p2273_p7 = pnand %p2271_p5, %p2268_p3 }
  0x1c   : > { %2276 = shalt.err (!%p2273_p7)
}
  0x1d   : > { %s2277_s3 = scalar_lea.vmem %s2480_s19, 1024  ;;  %p2285_p2 = scmp.lt.s32.totalorder %s2480_s19, %s2480_s19 }
  0x1e   : > { %p2278_p9 = scmp.ne.s32.totalorder %s2480_s19, %s2277_s3  ;;  %p2286_p6 = scmp.lt.s32.totalorder %s2277_s3, %s2277_s3 }
  0x20   : > { %p2280_p10 = pnand %p2278_p9, %p2266_p13  ;;  %p2287_p4 = por %p2286_p6, %p2285_p2 }
  0x22   : > { %p2281_p1 = pneg %p2280_p10 }
  0x24   : > { %p2288_p8 = pnand %p2287_p4, %p2281_p1 }
  0x26   : > { %2291 = shalt.err (!%p2288_p8)
}
  0x27   : > { %s2395_s4 = smov 512   ;;  %s2396_s5 = smov 32  }
  0x28   : > { %1967 = dma.hbm_to_vmem [thread:$0]  (!%p2487_p11), %s2988_s1, 1024, %s2480_s19, [#allocation7], %s2395_s4, %s2395_s4, %s2396_s5  }
  0x29   : > { %p24_p2 = scmp.eq.s32.totalorder %s23_s23, 0  ;;  %p33_p1 = scmp.ne.s32.totalorder %s2388_s11, %s2384_s10 }
  0x2a   : > { %p34_p4 = scmp.eq.s32.totalorder %s2392_s12, 0  ;;  %p1977_p6 = scmp.lt.s32.totalorder %s2392_s12, 2 }
  0x2b   : > { %s2523_s8 = scalar_select %p24_p2, %s2388_s11, %s26_s22  }
  0x2c   : > { %p35_p8 = por %p34_p4, %p33_p1  ;;  %p2997_p10 = scmp.eq.s32.totalorder %s2457_s13, 1 }
  0x2d   : > { %s123_s18 = sand.u32 1, %s2388_s11   ;;  %s1847_s24 = sshll.u32 %s2392_s12, 7 }
  0x2e   : > { %p2527_p12 = por %p2997_p10, %p33_p1  ;;  %s1802_s25 = sshll.u32 %s123_s18, 3 }
  0x2f   : > { %s2536_s27 = scalar_lea.hbm %s2987_s0, %s1847_s24  ;;  %s127_s19 = scalar_lea.vmem [#allocation3], %s1802_s25 }
  0x30   : > { %s135_s22 = sshll.u32 %s127_s19, 4  ;;  %p2538_p11 = pnand %p1977_p6, %p35_p8  ;;  %s2542_s22 = int_to_ptr.vmem [resolvable:$true] %s135_s22 }
  0x31   : > { %s124_s28 = scalar_lea.sflag [#allocation4], %s123_s18  ;;  %s2292_s29 = scalar_lea.hbm %s2536_s27, 128 }
  0x32   : > { %p2293_p13 = scmp.ne.s32.totalorder %s2536_s27, %s2292_s29  ;;  %p2294_p0 = pneg %p2538_p11 }
  0x33   : > { %s2297_s4 = scalar_lea.hbm %s2987_s0, 256  ;;  %p2298_p7 = scmp.lt.u32.totalorder %s2536_s27, %s2987_s0 }
  0x34   : > { %p2295_p3 = pnand %p2294_p0, %p2293_p13  ;;  %p2299_p9 = scmp.lt.u32.totalorder %s2297_s4, %s2292_s29 }
  0x35   : > { %p2301_p1 = scmp.lt.u32.totalorder %s2292_s29, %s2536_s27 }
  0x36   : > { %p2296_p5 = pneg %p2295_p3  ;;  %p2300_p2 = por %p2299_p9, %p2298_p7 }
  0x38   : > { %p2302_p4 = por %p2301_p1, %p2300_p2 }
  0x3a   : > { %p2303_p6 = pnand %p2302_p4, %p2296_p5 }
  0x3c   : > { %2306 = shalt.err (!%p2303_p6)
}
  0x3d   : > { %s2307_s7 = scalar_lea.vmem %s2542_s22, 128  ;;  %s2397_s18 = smov [#allocation3]  }
  0x3e   : > { %p2308_p8 = scmp.ne.s32.totalorder %s2542_s22, %s2307_s7  ;;  %s2312_s24 = sshll.u32 %s2397_s18, 4  ;;  %s2313_s24 = int_to_ptr.vmem [resolvable:$false] %s2312_s24 }
  0x3f   : > { %s2314_s25 = scalar_lea.vmem %s2313_s24, 256  ;;  %p2315_p3 = scmp.lt.s32.totalorder %s2542_s22, %s2313_s24 }
  0x40   : > { %p2310_p10 = pnand %p2308_p8, %p2294_p0  ;;  %p2316_p7 = scmp.lt.s32.totalorder %s2314_s25, %s2307_s7 }
  0x42   : > { %p2311_p13 = pneg %p2310_p10  ;;  %p2317_p9 = por %p2316_p7, %p2315_p3 }
  0x44   : > { %p2318_p2 = pnand %p2317_p9, %p2311_p13 }
  0x46   : > { %2321 = shalt.err (!%p2318_p2)
}
  0x47   : > { %1971 = dma.hbm_to_vmem [thread:$0]  (!%p2538_p11), %s2536_s27, 128, %s2542_s22, %s124_s28  }
  0x48   : > { %p3000_p5 = scmp.ne.s32.totalorder %s2995_s17, 0 }
  0x49   : > { %s2572_s20 = sand.u32 (!%p3000_p5), 1, %s2384_s10   ;;  %p3001_p0 = scmp.ne.s32.totalorder (!%p3000_p5), %s2993_s15, 0 }
  0x4a   : > { %144 = sbr.rel (%p3000_p5) target bundleno = 1462 (0x5b6), region = 28  ;;  %s1806_s26 = sshll.u32 (!%p3000_p5), %s2572_s20, 3 }
  0x4b   : > { %s147_s19 = scalar_lea.sflag (!%p3000_p5), [#allocation4], %s2572_s20  ;;  %s150_s29 = scalar_lea.vmem (!%p3000_p5), [#allocation3], %s1806_s26 }
  0x51   : > { %2367 = dma.done.wait (%p3001_p0), %s147_s19, 128  }
  0x52   : > { %2369 = vsyncadd (%p3001_p0), %s147_s19, 4294967168  ;;  %p3002_p11 = scmp.eq.s32.totalorder %s2457_s13, 0 }
  0x54   : > { %2371 = dma.done.wait (%p3002_p11), [#allocation7], 1024   ;;  %p3003_p1 = pmov %p3002_p11 }
  0x55   : > { %v192_v0 = vlaneseq  ;;  %v2398_v1 = vmov 0.0   ;;  %v175_v9 = vld [vmem:[%s150_s29] sm:$0xff]  ;;  %s2399_s15 = smov 125   ;;  %s2400_s17 = smov 126   ;;  %vm313_vm14 = vcmask 1022980   ;;  %vm305_vm15 = vcmask 1022976  }
  0x56   : > { %2373 = vsyncadd (%p3003_p1), [#allocation7], 4294966272  ;;  %182 = vst [vmem:[#allocation2 + $0x30] sm:$0xff] %v2398_v1  ;;  %971 = vmatprep.mubr.f32.mxu0 %v2398_v1  ;;  %581 = vmatprep.mubr.f32.mxu1 %v2398_v1  ;;  %v300_v10 = vcombine.low %v175_v9, %v175_v9  ;;  %v232_v12 = vcombine.high %v175_v9, %v175_v9  ;;  %s2401_s27 = smov 124   ;;  %s2402_s22 = smov 127   ;;  %v2601_v43 = vld [vmem:[#allocation6 + $0x10] sm:$0xff] }
  0x57   : > { %176 = vst [vmem:[#allocation2] sm:$0xff] %v2398_v1  ;;  %177 = vst [vmem:[#allocation2 + $0x8] sm:$0xff] %v2398_v1  ;;  %v193_v2 = vand.u32 127, %v192_v0  ;;  %303 = vrot.lane.b32.xlu1 %v175_v9, %s2399_s15  ;;  %s2403_s23 = smov 123   ;;  %s2404_s28 = smov 122   ;;  %v2603_v44 = vld [vmem:[#allocation6 + $0x30] sm:$0xff] }
  0x58   : > { %178 = vst [vmem:[#allocation2 + $0x10] sm:$0xff] %v2398_v1  ;;  %179 = vst [vmem:[#allocation2 + $0x18] sm:$0xff] %v2398_v1  ;;  %301 = vrot.lane.b32.xlu0 %v300_v10, %s2399_s15  ;;  %s2405_s30 = smov 121   ;;  %s2406_s3 = smov 32   ;;  %v2609_v45 = vld [vmem:[#allocation6 + $0x18] sm:$0xff] }
  0x59   : > { %180 = vst [vmem:[#allocation2 + $0x20] sm:$0xff] %v2398_v1  ;;  %181 = vst [vmem:[#allocation2 + $0x28] sm:$0xff] %v2398_v1  ;;  %v199_v3 = vand.u32 15, %v193_v2  ;;  %v194_v4 = vadd.s32 128, %v193_v2  ;;  %s2407_s4 = smov 96   ;;  %s2408_s5 = smov 3  }
  0x5a   : > { %184 = vst [vmem:[#allocation2 + $0x40] sm:$0xff] %v2398_v1  ;;  %185 = vst [vmem:[#allocation2 + $0x48] sm:$0xff] %v2398_v1  ;;  %s2409_s6 = smov 51   ;;  %s2410_s7 = smov 115  }
  0x5b   : > { %186 = vst [vmem:[#allocation2 + $0x50] sm:$0xff] %v2398_v1  ;;  %188 = vst [vmem:[#allocation2 + $0x60] sm:$0xff] %v2398_v1  ;;  %v1813_v5 = vadd.s32 1, %v199_v3  ;;  %v1815_v6 = vadd.s32 4294967295, %v199_v3  ;;  %v206_v7 = vand.u32 15, %v194_v4  ;;  %v1811_v8 = vadd.s32 2, %v199_v3 }
  0x5c   : > { %189 = vst [vmem:[#allocation2 + $0x68] sm:$0xff] %v2398_v1  ;;  %190 = vst [vmem:[#allocation2 + $0x70] sm:$0xff] %v2398_v1  ;;  %v1817_v19 = vadd.s32 4294967294, %v199_v3  ;;  %v1809_v20 = vadd.s32 3, %v199_v3  ;;  %v1819_v34 = vadd.s32 4294967293, %v199_v3  ;;  %v1821_v35 = vadd.s32 4294967292, %v199_v3 }
  0x5d   : > { %vm274_vm0 = vcmp.lt.s32.totalorder %v1813_v5, 16  ;;  %vm317_vm1 = vcmp.ge.s32.totalorder %v1815_v6, 0  ;;  %v1814_v13 = vadd.s32 1, %v206_v7  ;;  %vm242_vm2 = vcmp.lt.s32.totalorder %v1811_v8, 16  ;;  %s2411_s18 = smov 99   ;;  %s2412_s24 = smov 35  }
  0x5e   : > { %v282_v11 = vsel %vm274_vm0, %v175_v9, 0.0  ;;  %v1816_v14 = vadd.s32 4294967295, %v206_v7  ;;  %v1812_v15 = vadd.s32 2, %v206_v7  ;;  %v1818_v16 = vadd.s32 4294967294, %v206_v7  ;;  %s2413_s25 = smov 19   ;;  %s2414_s19 = smov 83  }
  0x5f   : > { %v327_v17 = vsel %vm317_vm1, %v175_v9, 0.0  ;;  %vm275_vm3 = vcmp.lt.s32.totalorder %v1814_v13, 16  ;;  %v250_v18 = vsel %vm242_vm2, %v175_v9, 0.0  ;;  %286 = vrot.lane.b32.xlu1 %v282_v11, %s2400_s17  ;;  %vm347_vm7 = vcmp.ge.s32.totalorder %v1817_v19, 0  ;;  %s2415_s29 = smov 64   ;;  %s2416_s15 = smov 28  }
  0x60   : > { %vm243_vm4 = vcmp.lt.s32.totalorder %v1812_v15, 16  ;;  %v283_v21 = vsel %vm275_vm3, %v232_v12, 0.0  ;;  %331 = vrot.lane.b32.xlu0 %v327_v17, %s2401_s27  ;;  %v254_v22 = vrot.slane %v250_v18, 4  ;;  %vm318_vm5 = vcmp.ge.s32.totalorder %v1816_v14, 0 }
  0x61   : > { %vm348_vm6 = vcmp.ge.s32.totalorder %v1818_v16, 0  ;;  %v251_v23 = vsel %vm243_vm4, %v232_v12, 0.0  ;;  %v1810_v24 = vadd.s32 3, %v206_v7  ;;  %vm223_vm8 = vcmp.lt.s32.totalorder %v1809_v20, 16 }
  0x62   : > { %v328_v25 = vsel %vm318_vm5, %v232_v12, 0.0  ;;  %v358_v26 = vsel %vm348_vm6, %v232_v12, 0.0  ;;  %v234_v27 = vsel %vm223_vm8, %v175_v9, 0.0  ;;  %v255_v28 = vrot.slane %v251_v23, 4 }
  0x63   : > { %288 = vrot.lane.b32.xlu1 %v283_v21, %s2400_s17  ;;  %v1820_v29 = vadd.s32 4294967293, %v206_v7  ;;  %v1822_v30 = vadd.s32 4294967292, %v206_v7  ;;  %vm224_vm9 = vcmp.lt.s32.totalorder %v1810_v24, 16  ;;  %236 = vst [vmem:[#allocation2 + $0x8] sm:$0xf] %v234_v27  ;;  %v357_v31 = vsel %vm347_vm7, %v175_v9, 0.0 }
  0x64   : > { %256 = vrot.lane.b32.xlu0 %v254_v22, %s2402_s22  ;;  %v235_v32 = vsel %vm224_vm9, %v232_v12, 0.0  ;;  %v362_v33 = vrot.slane %v358_v26, 4  ;;  %v361_v36 = vrot.slane %v357_v31, 4  ;;  %vm379_vm12 = vcmp.ge.s32.totalorder %v1819_v34, 0  ;;  %s2417_s17 = smov 26  }
  0x65   : > { %237 = vst [vmem:[#allocation2 + $0x10] sm:$0xf] %v235_v32  ;;  %vm380_vm10 = vcmp.ge.s32.totalorder %v1820_v29, 0  ;;  %vm410_vm11 = vcmp.ge.s32.totalorder %v1822_v30, 0  ;;  %vm409_vm13 = vcmp.ge.s32.totalorder %v1821_v35, 0  ;;  %v389_v39 = vsel %vm379_vm12, %v175_v9, 0.0 }
  0x66   : > { %v390_v37 = vsel %vm380_vm10, %v232_v12, 0.0  ;;  %v420_v38 = vsel %vm410_vm11, %v232_v12, 0.0  ;;  %v419_v40 = vsel %vm409_vm13, %v175_v9, 0.0  ;;  %vm310_vm0 = vcmask 1048556  }
  0x67   : > { %333 = vrot.lane.b32.xlu1 %v328_v25, %s2401_s27  ;;  %v424_v41 = vrot.slane %v420_v38, 4  ;;  %v423_v42 = vrot.slane %v419_v40, 4  ;;  %vm295_vm1 = vcmask 1044464   ;;  %vm340_vm2 = vcmask 1044448   ;;  %s2418_s27 = smov 27  }
  0x68   : > { %258 = vrot.lane.b32.xlu0 %v255_v28, %s2402_s22  ;;  %vm290_vm3 = vcmask 1031168   ;;  %vm298_vm4 = vcmask 1027072   ;;  %vm265_vm5 = vcmask 1048572   ;;  %vm335_vm6 = vcmask 1014784   ;;  %v2665_v28 = vld [vmem:[#allocation6 + $0x38] sm:$0xff]  ;;  %s1848_s22 = sshll.u32 %s2457_s13, 7 }
  0x69   : > { %vm343_vm7 = vcmask 1010688   ;;  %vm260_vm8 = vcmask 1039360   ;;  %vm268_vm9 = vcmask 1039364   ;;  %vm375_vm10 = vcmask 1006596   ;;  %s2420_s13 = smov [#allocation8]  }
  0x6a   : > { %vm367_vm11 = vcmask 1006592   ;;  %vm372_vm12 = vcmask 1048540   ;;  %vm405_vm13 = vcmask 994304  }
  0x6b   : > { %365 = vrot.lane.b32.xlu1 %v362_v33, %s2403_s23 }
  0x6c   : > { %363 = vrot.lane.b32.xlu0 %v361_v36, %s2403_s23  ;;  %s174_s23 = scalar_lea.vmem [#allocation8], %s1806_s26  ;;  %s2326_s26 = sshll.u32 %s2420_s13, 4  ;;  %s2327_s26 = int_to_ptr.vmem [resolvable:$false] %s2326_s26 }
  0x6f   : > { %395 = vrot.lane.b32.xlu1 %v390_v37, %s2404_s28 }
  0x70   : > { %393 = vrot.lane.b32.xlu0 %v389_v39, %s2404_s28  ;;  %s1718_s28 = sshll.u32 %s174_s23, 4  ;;  %s2945_s28 = int_to_ptr.vmem [resolvable:$true] %s1718_s28 }
  0x71   : > { %p2329_p10 = scmp.lt.s32.totalorder %s2945_s28, %s2327_s26 }
  0x73   : > { %427 = vrot.lane.b32.xlu1 %v424_v41, %s2405_s30 }
  0x74   : > { %425 = vrot.lane.b32.xlu0 %v423_v42, %s2405_s30 }
  0x77   : > { %858 = vrot.lane.b32.xlu1 %v2601_v43, %s2406_s3 }
  0x78   : > { %860 = vrot.lane.b32.xlu0 %v2603_v44, %s2406_s3 }
  0x7b   : > { %598 = vrot.lane.b32.xlu1 %v2601_v43, %s2407_s4 }
  0x7c   : > { %1142 = vrot.lane.b32.xlu0 %v2609_v45, %s2407_s4 }
  0xc9   : > { %v304_v46 = vpop.permute.xlu1 %303 }
  0xca   : > { %314 = vst.msk [vmem:[#allocation2 + $0x30] sm:$0xf0] %vm313_vm14, %v304_v46  ;;  %v302_v47 = vpop.permute.xlu0 %301  ;;  %vm397_vm14 = vcmask 998400  }
  0xcb   : > { %v306_v48 = vsel %vm305_vm15, %v302_v47, %v304_v46  ;;  %311 = vst.msk [vmem:[#allocation2 + $0x20] sm:$0xf0] %vm310_vm0, %v302_v47  ;;  %vm402_vm15 = vcmask 1044432   ;;  %vm437_vm0 = vcmask 990212  }
  0xcc   : > { %312 = vst [vmem:[#allocation2 + $0x28] sm:$0xf0] %v306_v48 }
  0xd1   : > { %v287_v49 = vpop.permute.xlu1 %286 }
  0xd2   : > { %296 = vst.msk [vmem:[#allocation2 + $0x20] sm:$0xf] %vm295_vm1, %v287_v49  ;;  %v332_v50 = vpop.permute.xlu0 %331  ;;  %vm429_vm1 = vcmask 990208  }
  0xd3   : > { %341 = vst.msk [vmem:[#allocation2 + $0x40] sm:$0xf] %vm340_vm2, %v332_v50  ;;  %vm434_vm2 = vcmask 1048524  }
  0xd5   : > { %v289_v51 = vpop.permute.xlu1 %288 }
  0xd6   : > { %v291_v52 = vsel %vm290_vm3, %v287_v49, %v289_v51  ;;  %299 = vst.msk [vmem:[#allocation2 + $0x30] sm:$0xf] %vm298_vm4, %v289_v51  ;;  %v257_v53 = vpop.permute.xlu0 %256  ;;  %vm886_vm3 = vcmask 23552   ;;  %vm1038_vm4 = vcmask 941056  }
  0xd7   : > { %297 = vst [vmem:[#allocation2 + $0x28] sm:$0xf] %v291_v52  ;;  %266 = vst.msk [vmem:[#allocation2] sm:$0xf0] %vm265_vm5, %v257_v53  ;;  %vm493_vm5 = vcmask 416768  }
  0xd9   : > { %v334_v54 = vpop.permute.xlu1 %333  ;;  %v448_v61 = vld [vmem:[#allocation2 + $0x20] sm:$0xff] }
  0xda   : > { %v336_v55 = vsel %vm335_vm6, %v332_v50, %v334_v54  ;;  %344 = vst.msk [vmem:[#allocation2 + $0x50] sm:$0xf] %vm343_vm7, %v334_v54  ;;  %v259_v56 = vpop.permute.xlu0 %258  ;;  %vm1170_vm6 = vcmask 809984   ;;  %vm510_vm7 = vcmask 261120  }
  0xdb   : > { %342 = vst [vmem:[#allocation2 + $0x48] sm:$0xf] %v336_v55  ;;  %v261_v57 = vsel %vm260_vm8, %v257_v53, %v259_v56  ;;  %269 = vst.msk [vmem:[#allocation2 + $0x10] sm:$0xf0] %vm268_vm9, %v259_v56  ;;  %vm626_vm8 = vcmask 285696   ;;  %vm1300_vm9 = vcmask 678912  }
  0xdc   : > { %267 = vst [vmem:[#allocation2 + $0x8] sm:$0xf0] %v261_v57 }
  0xdd   : > { %v366_v58 = vpop.permute.xlu1 %365  ;;  %v994_v5 = vld [vmem:[#allocation2 + $0x30] sm:$0xff] }
  0xde   : > { %376 = vst.msk [vmem:[#allocation2 + $0x50] sm:$0xf0] %vm375_vm10, %v366_v58  ;;  %v364_v59 = vpop.permute.xlu0 %363  ;;  %v445_v60 = vld [vmem:[#allocation2] sm:$0xff]  ;;  %v2052_v6 = vpack.i.bf16 %v2398_v1, %v994_v5  ;;  %v449_v12 = vld [vmem:[#allocation2 + $0x28] sm:$0xff]  ;;  %vm756_vm10 = vcmask 154624  }
  0xdf   : > { %v368_v62 = vsel %vm367_vm11, %v364_v59, %v366_v58  ;;  %373 = vst.msk [vmem:[#allocation2 + $0x40] sm:$0xf0] %vm372_vm12, %v364_v59  ;;  %v2037_v63 = vpack.i.bf16 %v448_v61, %v445_v60  ;;  %v2092_v13 = vpack.i.bf16 %v994_v5, %v449_v12  ;;  %vm1412_vm11 = vcmask 1043456  }
  0xe0   : > { %374 = vst [vmem:[#allocation2 + $0x48] sm:$0xf0] %v368_v62  ;;  %vm1430_vm12 = vcmask 31744  }
  0xe1   : > { %v396_v0 = vpop.permute.xlu1 %395  ;;  %2038 = vrot.lane.b32.xlu0 %v2037_v63, %s2408_s5 }
  0xe2   : > { %406 = vst.msk [vmem:[#allocation2 + $0x70] sm:$0xf] %vm405_vm13, %v396_v0  ;;  %v394_v2 = vpop.permute.xlu0 %393  ;;  %v991_v14 = vld [vmem:[#allocation2 + $0x10] sm:$0xff]  ;;  %vm1525_vm13 = vcmask 130048  }
  0xe3   : > { %v398_v3 = vsel %vm397_vm14, %v394_v2, %v396_v0  ;;  %403 = vst.msk [vmem:[#allocation2 + $0x60] sm:$0xf] %vm402_vm15, %v394_v2  ;;  %v2112_v17 = vpack.i.bf16 %v2398_v1, %v991_v14  ;;  %v446_v20 = vld [vmem:[#allocation2 + $0x8] sm:$0xff]  ;;  %vm1605_vm14 = vcmask 3072   ;;  %vm1625_vm15 = vcmask 7172  }
  0xe4   : > { %404 = vst [vmem:[#allocation2 + $0x68] sm:$0xf] %v398_v3  ;;  %v2157_v21 = vpack.i.bf16 %v991_v14, %v446_v20  ;;  %v2177_v26 = vpack.i.bf16 %v449_v12, %v446_v20 }
  0xe5   : > { %v428_v4 = vpop.permute.xlu1 %427  ;;  %2048 = vrot.lane.b32.xlu0 %v2037_v63, %s2409_s6  ;;  %v997_v15 = vld [vmem:[#allocation2 + $0x50] sm:$0xff] }
  0xe6   : > { %438 = vst.msk [vmem:[#allocation2 + $0x70] sm:$0xf0] %vm437_vm0, %v428_v4  ;;  %v426_v7 = vpop.permute.xlu0 %425  ;;  %v451_v9 = vld [vmem:[#allocation2 + $0x40] sm:$0xff]  ;;  %v2117_v16 = vpack.i.bf16 %v2398_v1, %v997_v15 }
  0xe7   : > { %v430_v8 = vsel %vm429_vm1, %v426_v7, %v428_v4  ;;  %435 = vst.msk [vmem:[#allocation2 + $0x60] sm:$0xf0] %vm434_vm2, %v426_v7  ;;  %v452_v24 = vld [vmem:[#allocation2 + $0x48] sm:$0xff] }
  0xe8   : > { %436 = vst [vmem:[#allocation2 + $0x68] sm:$0xf0] %v430_v8  ;;  %v2162_v25 = vpack.i.bf16 %v997_v15, %v452_v24 }
  0xe9   : > { %2053 = vrot.lane.b32.xlu0 %v2052_v6, %s2410_s7  ;;  %v2679_v32 = vpop.permute.xlu1 %858 }
  0xea   : > { %v2669_v29 = vpop.permute.xlu0 %860 }
  0xed   : > { %v1000_v18 = vld [vmem:[#allocation2 + $0x70] sm:$0xff]  ;;  %v2683_v34 = vpop.permute.xlu1 %598 }
  0xee   : > { %v454_v10 = vld [vmem:[#allocation2 + $0x60] sm:$0xff]  ;;  %v2137_v19 = vpack.i.bf16 %v2398_v1, %v1000_v18  ;;  %v2673_v30 = vpop.permute.xlu0 %1142 }
  0xef   : > { %v2057_v11 = vpack.i.bf16 %v454_v10, %v451_v9  ;;  %v455_v22 = vld [vmem:[#allocation2 + $0x68] sm:$0xff] }
  0xf0   : > { %v2167_v23 = vpack.i.bf16 %v1000_v18, %v455_v22  ;;  %v2192_v27 = vpack.i.bf16 %v455_v22, %v452_v24 }
  0xf1   : > { %2058 = vrot.lane.b32.xlu0 %v2057_v11, %s2409_s6  ;;  %2043 = vrot.lane.b32.xlu1 %v2057_v11, %s2408_s5 }
  0xf5   : > { %2068 = vrot.lane.b32.xlu0 %v2052_v6, %s2411_s18  ;;  %2063 = vrot.lane.b32.xlu1 %v2037_v63, %s2412_s24 }
  0xf9   : > { %2073 = vrot.lane.b32.xlu0 %v2057_v11, %s2412_s24  ;;  %2088 = vrot.lane.b32.xlu1 %v2057_v11, %s2413_s25 }
  0xfd   : > { %2078 = vrot.lane.b32.xlu0 %v2037_v63, %s2413_s25  ;;  %2093 = vrot.lane.b32.xlu1 %v2092_v13, %s2408_s5 }
 0x101   : > { %2083 = vrot.lane.b32.xlu0 %v2052_v6, %s2414_s19  ;;  %2098 = vrot.lane.b32.xlu1 %v2092_v13, %s2409_s6 }
 0x105   : > { %2103 = vrot.lane.b32.xlu0 %v2092_v13, %s2412_s24  ;;  %2108 = vrot.lane.b32.xlu1 %v2092_v13, %s2413_s25 }
 0x109   : > { %2118 = vrot.lane.b32.xlu0 %v2117_v16, %s2410_s7  ;;  %2113 = vrot.lane.b32.xlu1 %v2112_v17, %s2410_s7 }
 0x10d   : > { %2138 = vrot.lane.b32.xlu0 %v2137_v19, %s2411_s18  ;;  %2123 = vrot.lane.b32.xlu1 %v2137_v19, %s2410_s7 }
 0x111   : > { %2153 = vrot.lane.b32.xlu0 %v2137_v19, %s2414_s19  ;;  %2128 = vrot.lane.b32.xlu1 %v2112_v17, %s2411_s18 }
 0x115   : > { %2133 = vrot.lane.b32.xlu1 %v2117_v16, %s2411_s18  ;;  %2158 = vrot.lane.b32.xlu0 %v2157_v21, %s2408_s5 }
 0x119   : > { %2143 = vrot.lane.b32.xlu1 %v2112_v17, %s2414_s19  ;;  %2168 = vrot.lane.b32.xlu0 %v2167_v23, %s2408_s5 }
 0x11d   : > { %2148 = vrot.lane.b32.xlu1 %v2117_v16, %s2414_s19  ;;  %2173 = vrot.lane.b32.xlu0 %v2157_v21, %s2409_s6 }
 0x121   : > { %2163 = vrot.lane.b32.xlu1 %v2162_v25, %s2408_s5  ;;  %2183 = vrot.lane.b32.xlu0 %v2162_v25, %s2409_s6  ;;  %s1704_s5 = scalar_lea.sflag [#allocation5], %s2572_s20 }
 0x125   : > { %2178 = vrot.lane.b32.xlu1 %v2177_v26, %s2410_s7  ;;  %2193 = vrot.lane.b32.xlu0 %v2192_v27, %s2410_s7  ;;  %s2328_s7 = scalar_lea.vmem %s2327_s26, 256 }
 0x129   : > { %2188 = vrot.lane.b32.xlu1 %v2167_v23, %s2409_s6  ;;  %2208 = vrot.lane.b32.xlu0 %v2162_v25, %s2412_s24  ;;  %s2322_s6 = scalar_lea.vmem %s2945_s28, 128 }
 0x12a   : > { %p2323_p4 = scmp.ne.s32.totalorder %s2945_s28, %s2322_s6  ;;  %p2330_p13 = scmp.lt.s32.totalorder %s2328_s7, %s2322_s6 }
 0x12c   : > { %p2324_p6 = pnand %p2323_p4, %p2527_p12  ;;  %p2331_p3 = por %p2330_p13, %p2329_p10 }
 0x12d   : > { %2198 = vrot.lane.b32.xlu1 %v2157_v21, %s2412_s24  ;;  %2223 = vrot.lane.b32.xlu0 %v2157_v21, %s2413_s25 }
 0x12e   : > { %p2325_p8 = pneg %p2324_p6 }
 0x130   : > { %p2332_p7 = pnand %p2331_p3, %p2325_p8 }
 0x131   : > { %2203 = vrot.lane.b32.xlu1 %v2177_v26, %s2411_s18  ;;  %2228 = vrot.lane.b32.xlu0 %v2177_v26, %s2414_s19 }
 0x135   : > { %2213 = vrot.lane.b32.xlu1 %v2167_v23, %s2412_s24  ;;  %2238 = vrot.lane.b32.xlu0 %v2167_v23, %s2413_s25 }
 0x139   : > { %2218 = vrot.lane.b32.xlu1 %v2192_v27, %s2411_s18  ;;  %2243 = vrot.lane.b32.xlu0 %v2192_v27, %s2414_s19 }
 0x13d   : > { %2233 = vrot.lane.b32.xlu1 %v2162_v25, %s2413_s25  ;;  %728 = vrot.lane.b32.xlu0 %v2601_v43, %s2415_s29 }
 0x141   : > { %600 = vrot.lane.b32.xlu1 %v2603_v44, %s2407_s4  ;;  %730 = vrot.lane.b32.xlu0 %v2603_v44, %s2415_s29 }
 0x145   : > { %1144 = vrot.lane.b32.xlu1 %v2665_v28, %s2407_s4  ;;  %s2943_s4 = scalar_lea.hbm %s2989_s2, %s1848_s22 }
 0x149   : > { %1272 = vrot.lane.b32.xlu1 %v2609_v45, %s2415_s29 }
 0x14d   : > { %1274 = vrot.lane.b32.xlu1 %v2665_v28, %s2415_s29 }
 0x151   : > { %1420 = vrot.lane.b32.xlu1 %v2609_v45, %s2406_s3 }
 0x153   : > { %v2039_v31 = vpop.permute.xlu0 %2038 }
 0x154   : > { %v2041_v61 = vunpack.i.h.bf16 %v2039_v31  ;;  %v2040_v62 = vunpack.i.l.bf16 %v2039_v31 }
 0x155   : > { %1422 = vrot.lane.b32.xlu1 %v2665_v28, %s2406_s3 }
 0x157   : > { %v2681_v33 = vpop.permute.xlu0 %2048 }
 0x158   : > { %v2051_v14 = vunpack.i.h.bf16 %v2681_v33  ;;  %v2050_v15 = vunpack.i.l.bf16 %v2681_v33 }
 0x159   : > { %1424 = vrot.lane.b32.xlu1 %v2609_v45, %s2416_s15 }
 0x15b   : > { %v2685_v35 = vpop.permute.xlu0 %2053 }
 0x15c   : > { %v2056_v6 = vunpack.i.h.bf16 %v2685_v35  ;;  %v2055_v7 = vunpack.i.l.bf16 %v2685_v35 }
 0x15d   : > { %1426 = vrot.lane.b32.xlu1 %v2665_v28, %s2416_s15 }
 0x15e   : > { %v1042_v20 = vsel %vm1038_vm4, %v2055_v7, %v2056_v6 }
 0x161   : > { %1515 = vrot.lane.b32.xlu1 %v2609_v45, %s2417_s17 }
 0x163   : > { %v2687_v36 = vpop.permute.xlu1 %2043  ;;  %v2689_v37 = vpop.permute.xlu0 %2058 }
 0x164   : > { %v2046_v16 = vunpack.i.h.bf16 %v2687_v36  ;;  %v2045_v17 = vunpack.i.l.bf16 %v2687_v36  ;;  %v2061_v25 = vunpack.i.h.bf16 %v2689_v37  ;;  %v2060_v26 = vunpack.i.l.bf16 %v2689_v37 }
 0x165   : > { %1517 = vrot.lane.b32.xlu1 %v2665_v28, %s2417_s17 }
 0x167   : > { %v2691_v38 = vpop.permute.xlu1 %2063  ;;  %v2693_v39 = vpop.permute.xlu0 %2068 }
 0x169   : > { %1519 = vrot.lane.b32.xlu1 %v2609_v45, %s2418_s27 }
 0x16b   : > { %v2695_v40 = vpop.permute.xlu1 %2088  ;;  %v2697_v41 = vpop.permute.xlu0 %2073 }
 0x16d   : > { %1521 = vrot.lane.b32.xlu1 %v2665_v28, %s2418_s27 }
 0x16f   : > { %v2094_v42 = vpop.permute.xlu1 %2093  ;;  %v2699_v46 = vpop.permute.xlu0 %2078 }
 0x170   : > { %v2096_v57 = vunpack.i.h.bf16 %v2094_v42  ;;  %v2095_v58 = vunpack.i.l.bf16 %v2094_v42 }
 0x172   : > { %v890_v3 = vsel %vm886_vm3, %v2095_v58, %v2096_v57  ;;  %v889_v5 = vsel %vm886_vm3, %v2041_v61, %v2095_v58 }
 0x173   : > { %v2099_v47 = vpop.permute.xlu1 %2098  ;;  %v2701_v48 = vpop.permute.xlu0 %2083 }
 0x174   : > { %v2101_v12 = vunpack.i.h.bf16 %v2099_v47  ;;  %v2100_v13 = vunpack.i.l.bf16 %v2099_v47 }
 0x176   : > { %v497_v27 = vsel %vm493_vm5, %v2100_v13, %v2101_v12  ;;  %v496_v31 = vsel %vm493_vm5, %v2051_v14, %v2100_v13 }
 0x177   : > { %v2703_v49 = vpop.permute.xlu1 %2108  ;;  %v2705_v50 = vpop.permute.xlu0 %2103 }
 0x17b   : > { %v2707_v51 = vpop.permute.xlu0 %2118  ;;  %v2709_v52 = vpop.permute.xlu1 %2113 }
 0x17c   : > { %v2116_v21 = vunpack.i.h.bf16 %v2709_v52  ;;  %v2115_v22 = vunpack.i.l.bf16 %v2709_v52  ;;  %v2121_v6 = vunpack.i.h.bf16 %v2707_v51 }
 0x17f   : > { %v2711_v53 = vpop.permute.xlu0 %2138  ;;  %v2713_v54 = vpop.permute.xlu1 %2123 }
 0x180   : > { %v2126_v57 = vunpack.i.h.bf16 %v2713_v54  ;;  %v2125_v52 = vunpack.i.l.bf16 %v2713_v54 }
 0x183   : > { %v2715_v55 = vpop.permute.xlu0 %2153  ;;  %v2717_v56 = vpop.permute.xlu1 %2128 }
 0x187   : > { %v2719_v59 = vpop.permute.xlu1 %2133  ;;  %v2159_v60 = vpop.permute.xlu0 %2158 }
 0x188   : > { %v2161_v63 = vunpack.i.h.bf16 %v2159_v60  ;;  %v2160_v0 = vunpack.i.l.bf16 %v2159_v60 }
 0x18a   : > { %v888_v2 = vsel %vm886_vm3, %v2160_v0, %v2161_v63  ;;  %v887_v4 = vsel %vm886_vm3, %v2040_v62, %v2160_v0  ;;  %v2066_v63 = vunpack.i.h.bf16 %v2691_v38 }
 0x18b   : > { %v2727_v8 = vpop.permute.xlu1 %2143  ;;  %v2169_v9 = vpop.permute.xlu0 %2168  ;;  %v1892_v10 = vpack.c.bf16 %v890_v3, %v888_v2  ;;  %v1894_v11 = vpack.c.bf16 %v889_v5, %v887_v4  ;;  %v1040_v3 = vsel %vm1038_vm4, %v2115_v22, %v2116_v21  ;;  %v2071_v4 = vunpack.i.h.bf16 %v2693_v39 }
 0x18c   : > { %v2171_v33 = vunpack.i.h.bf16 %v2169_v9  ;;  %v2170_v36 = vunpack.i.l.bf16 %v2169_v9  ;;  %v2070_v5 = vunpack.i.l.bf16 %v2693_v39  ;;  %v2120_v9 = vunpack.i.l.bf16 %v2707_v51 }
 0x18d   : > { %1893 = vmatprep.subr.bf16.mxu0 %v1892_v10  ;;  %v1900_v21 = vpack.c.bf16 %v1042_v20, %v1040_v3  ;;  %v2131_v51 = vunpack.i.h.bf16 %v2717_v56  ;;  %v2146_v39 = vunpack.i.h.bf16 %v2727_v8 }
 0x18e   : > { %1895 = vmatpush1.bf16.msra.mxu0 %v1894_v11  ;;  %v894_v10 = vsel %vm886_vm3, %v2170_v36, %v2171_v33  ;;  %v893_v12 = vsel %vm886_vm3, %v2046_v16, %v2170_v36  ;;  %v2065_v16 = vunpack.i.l.bf16 %v2691_v38  ;;  %v1174_v36 = vsel %vm1170_vm6, %v2070_v5, %v2071_v4 }
 0x18f   : > { %v2733_v18 = vpop.permute.xlu1 %2148  ;;  %v2174_v19 = vpop.permute.xlu0 %2173  ;;  %v1044_v35 = vsel %vm1038_vm4, %v2120_v9, %v2121_v6  ;;  %v2106_v6 = vunpack.i.h.bf16 %v2705_v50 }
 0x190   : > { %v2176_v23 = vunpack.i.h.bf16 %v2174_v19  ;;  %v2175_v24 = vunpack.i.l.bf16 %v2174_v19 }
 0x192   : > { %v495_v42 = vsel %vm493_vm5, %v2175_v24, %v2176_v23  ;;  %v494_v47 = vsel %vm493_vm5, %v2050_v15, %v2175_v24  ;;  %v1046_v23 = vsel %vm1038_vm4, %v2125_v52, %v2126_v57  ;;  %v2130_v24 = vunpack.i.l.bf16 %v2717_v56 }
 0x193   : > { %v2164_v58 = vpop.permute.xlu1 %2163  ;;  %v2184_v60 = vpop.permute.xlu0 %2183  ;;  %v1868_v61 = vpack.c.bf16 %v497_v27, %v495_v42  ;;  %v1870_v62 = vpack.c.bf16 %v496_v31, %v494_v47  ;;  %v2091_v57 = vunpack.i.h.bf16 %v2695_v40  ;;  %v1904_v3 = vpack.c.bf16 %v1046_v23, %v1044_v35 }
 0x194   : > { %v2166_v0 = vunpack.i.h.bf16 %v2164_v58  ;;  %v2165_v2 = vunpack.i.l.bf16 %v2164_v58  ;;  %v2186_v42 = vunpack.i.h.bf16 %v2184_v60  ;;  %v2185_v47 = vunpack.i.l.bf16 %v2184_v60 }
 0x195   : > { %1869 = vmatprep.subr.bf16.mxu1 %v1868_v61  ;;  %v2086_v60 = vunpack.i.h.bf16 %v2701_v48  ;;  %v2145_v56 = vunpack.i.l.bf16 %v2727_v8 }
 0x196   : > { %1871 = vmatpush1.bf16.msra.mxu1 %v1870_v62  ;;  %v892_v54 = vsel %vm886_vm3, %v2165_v2, %v2166_v0  ;;  %v891_v11 = vsel %vm886_vm3, %v2045_v17, %v2165_v2 }
 0x197   : > { %v2179_v13 = vpop.permute.xlu1 %2178  ;;  %v2194_v14 = vpop.permute.xlu0 %2193  ;;  %v1896_v15 = vpack.c.bf16 %v894_v10, %v892_v54  ;;  %v1898_v19 = vpack.c.bf16 %v893_v12, %v891_v11  ;;  %v499_v10 = vsel %vm493_vm5, %v2185_v47, %v2186_v42  ;;  %v1172_v11 = vsel %vm1170_vm6, %v2130_v24, %v2131_v51 }
 0x198   : > { %v2181_v27 = vunpack.i.h.bf16 %v2179_v13  ;;  %v2180_v31 = vunpack.i.l.bf16 %v2179_v13  ;;  %v2196_v33 = vunpack.i.h.bf16 %v2194_v14  ;;  %v2195_v58 = vunpack.i.l.bf16 %v2194_v14 }
 0x199   : > { %1897 = vmatprep.subr.bf16.mxu0 %v1896_v15  ;;  %v2136_v13 = vunpack.i.h.bf16 %v2719_v59  ;;  %v2076_v42 = vunpack.i.h.bf16 %v2697_v41 }
 0x19a   : > { %v1041_v17 = vsel %vm1038_vm4, %v2181_v27, %v2055_v7  ;;  %v1039_v20 = vsel %vm1038_vm4, %v2180_v31, %v2115_v22  ;;  %1899 = vmatpush1.bf16.msra.mxu0 %v1898_v19  ;;  %v2105_v7 = vunpack.i.l.bf16 %v2705_v50  ;;  %v1045_v54 = vsel %vm1038_vm4, %v2196_v33, %v2125_v52 }
 0x19b   : > { %v1902_v61 = vpack.c.bf16 %v1041_v17, %v1039_v20  ;;  %v2189_v62 = vpop.permute.xlu1 %2188  ;;  %v2771_v0 = vpop.permute.xlu0 %2208  ;;  %1901 = vmatprep.subr.bf16.mxu0 %v1900_v21  ;;  %v1043_v4 = vsel %vm1038_vm4, %v2195_v58, %v2120_v9  ;;  %v498_v52 = vsel %vm493_vm5, %v2060_v26, %v2185_v47  ;;  %v2085_v9 = vunpack.i.l.bf16 %v2701_v48 }
 0x19c   : > { %v2191_v22 = vunpack.i.h.bf16 %v2189_v62  ;;  %v2190_v2 = vunpack.i.l.bf16 %v2189_v62  ;;  %v2135_v21 = vunpack.i.l.bf16 %v2719_v59  ;;  %v1906_v23 = vpack.c.bf16 %v1045_v54, %v1043_v4 }
 0x19d   : > { %1829 = vmatmul.mubr.msk.f32.vlgmr.msra.gmra.mrb[0].mxu0 %vm510_vm7, %v2679_v32  ;;  %v629_v37 = vsel %vm626_vm8, %v2066_v63, %v2105_v7  ;;  %v2140_v26 = vunpack.i.l.bf16 %v2711_v53  ;;  %v1908_v31 = vpack.c.bf16 %v1174_v36, %v1172_v11  ;;  %v630_v38 = vsel %vm626_vm8, %v2105_v7, %v2106_v6 }
 0x19e   : > { %1903 = vmatpush1.bf16.msra.mxu0 %v1902_v61  ;;  %977 = vmatprep.mubr.f32.mxu0 %v2398_v1  ;;  %v501_v12 = vsel %vm493_vm5, %v2190_v2, %v2191_v22  ;;  %v500_v32 = vsel %vm493_vm5, %v2061_v25, %v2190_v2  ;;  %v2141_v25 = vunpack.i.h.bf16 %v2711_v53  ;;  %v2081_v63 = vunpack.i.h.bf16 %v2699_v46 }
 0x19f   : > { %v2199_v14 = vpop.permute.xlu1 %2198  ;;  %v2794_v15 = vpop.permute.xlu0 %2223  ;;  %1905 = vmatprep.subr.bf16.mxu0 %v1904_v3  ;;  %v1872_v50 = vpack.c.bf16 %v501_v12, %v499_v10  ;;  %v1874_v19 = vpack.c.bf16 %v500_v32, %v498_v52  ;;  %v2110_v58 = vunpack.i.l.bf16 %v2703_v49  ;;  %v1176_v62 = vsel %vm1170_vm6, %v2135_v21, %v2136_v13 }
 0x1a0   : > { %v2201_v51 = vunpack.i.h.bf16 %v2199_v14  ;;  %v2200_v27 = vunpack.i.l.bf16 %v2199_v14  ;;  %v2819_v35 = vsel %vm1300_vm9, %v2085_v9, %v2086_v60  ;;  %v2111_v7 = vunpack.i.h.bf16 %v2703_v49 }
 0x1a1   : > { %1873 = vmatprep.subr.bf16.mxu1 %v1872_v50  ;;  %1830 = vmatmul.mubr.msk.f32.gmra.mrb[2].mxu0 %vm510_vm7, %v2669_v29  ;;  %v2211_v22 = vunpack.i.h.bf16 %v2771_v0  ;;  %v2210_v2 = vunpack.i.l.bf16 %v2771_v0  ;;  %v1178_v3 = vsel %vm1170_vm6, %v2140_v26, %v2141_v25  ;;  %v2226_v54 = vunpack.i.h.bf16 %v2794_v15 }
 0x1a2   : > { %v627_v47 = vsel %vm626_vm8, %v2065_v16, %v2200_v27  ;;  %1875 = vmatpush1.bf16.msra.mxu1 %v1874_v19  ;;  %1907 = vmatpush1.bf16.msra.mxu0 %v1906_v23  ;;  %v628_v33 = vsel %vm626_vm8, %v2200_v27, %v2201_v51  ;;  %v2225_v4 = vunpack.i.l.bf16 %v2794_v15  ;;  %v2075_v0 = vunpack.i.l.bf16 %v2697_v41 }
 0x1a3   : > { %v1878_v17 = vpack.c.bf16 %v629_v37, %v627_v47  ;;  %v2204_v20 = vpop.permute.xlu1 %2203  ;;  %v2810_v61 = vpop.permute.xlu0 %2228  ;;  %1909 = vmatprep.subr.bf16.mxu0 %v1908_v31  ;;  %v1876_v29 = vpack.c.bf16 %v630_v38, %v628_v33  ;;  %1125 = vmatprep.mubr.f32.mxu0 %v2398_v1  ;;  %v1912_v6 = vpack.c.bf16 %v1178_v3, %v1176_v62  ;;  %v2090_v41 = vunpack.i.l.bf16 %v2695_v40 }
 0x1a4   : > { %v2206_v36 = vunpack.i.h.bf16 %v2204_v20  ;;  %v2205_v16 = vunpack.i.l.bf16 %v2204_v20  ;;  %v631_v52 = vsel %vm626_vm8, %v2075_v0, %v2210_v2  ;;  %v632_v32 = vsel %vm626_vm8, %v2210_v2, %v2211_v22 }
 0x1a5   : > { %1877 = vmatprep.subr.bf16.mxu1 %v1876_v29  ;;  %1823 = vmatmul.mubr.msk.f32.vlgmr.msra.gmra.mrb[0].mxu1 %vm510_vm7, %v2601_v43  ;;  %v2839_v43 = vsel %vm756_vm10, %v2081_v63, %v2110_v58  ;;  %v760_v13 = vsel %vm756_vm10, %v2110_v58, %v2111_v7  ;;  %v2080_v14 = vunpack.i.l.bf16 %v2699_v46  ;;  %v758_v50 = vsel %vm756_vm10, %v2225_v4, %v2226_v54 }
 0x1a6   : > { %v1173_v49 = vsel %vm1170_vm6, %v2206_v36, %v2070_v5  ;;  %v1171_v60 = vsel %vm1170_vm6, %v2205_v16, %v2130_v24  ;;  %1879 = vmatpush1.bf16.msra.mxu1 %v1878_v17  ;;  %1831 = vmatmul.mubr.msk.f32.vlgmr.msra.gmra.mrb[0].mxu0 %vm510_vm7, %v2609_v45  ;;  %v2151_v19 = vunpack.i.h.bf16 %v2733_v18  ;;  %v2150_v23 = vunpack.i.l.bf16 %v2733_v18 }
 0x1a7   : > { %v1910_v10 = vpack.c.bf16 %v1173_v49, %v1171_v60  ;;  %v2214_v11 = vpop.permute.xlu1 %2213  ;;  %587 = vmatprep.mubr.f32.mxu1 %v2398_v1  ;;  %v2239_v12 = vpop.permute.xlu0 %2238  ;;  %1131 = vmatprep.mubr.f32.mxu0 %v2398_v1  ;;  %v2231_v46 = vunpack.i.h.bf16 %v2810_v61  ;;  %v1302_v31 = vsel %vm1300_vm9, %v2145_v56, %v2146_v39  ;;  %v2230_v47 = vunpack.i.l.bf16 %v2810_v61  ;;  %v439_v39 = vld [vmem:[#allocation6] sm:$0xff] }
 0x1a8   : > { %v2216_v5 = vunpack.i.h.bf16 %v2214_v11  ;;  %v2215_v24 = vunpack.i.l.bf16 %v2214_v11  ;;  %v2240_v33 = vunpack.i.l.bf16 %v2239_v12  ;;  %v1884_v18 = vpack.c.bf16 %v760_v13, %v758_v50 }
 0x1a9   : > { %1911 = vmatpush1.bf16.msra.mxu0 %v1910_v10  ;;  %1824 = vmatmul.mubr.msk.f32.gmra.mrb[2].mxu1 %vm510_vm7, %v2603_v44  ;;  %v2156_v38 = vunpack.i.h.bf16 %v2715_v55  ;;  %v2241_v63 = vunpack.i.h.bf16 %v2239_v12  ;;  %v2155_v29 = vunpack.i.l.bf16 %v2715_v55  ;;  %v1916_v16 = vpack.c.bf16 %v2819_v35, %v1302_v31 }
 0x1aa   : > { %v633_v8 = vsel %vm626_vm8, %v2076_v42, %v2215_v24  ;;  %1913 = vmatprep.subr.bf16.mxu0 %v1912_v6  ;;  %v634_v15 = vsel %vm626_vm8, %v2215_v24, %v2216_v5  ;;  %711 = vmatprep.mubr.f32.mxu1 %v2398_v1  ;;  %v757_v42 = vsel %vm756_vm10, %v2080_v14, %v2225_v4 }
 0x1ab   : > { %v1882_v44 = vpack.c.bf16 %v633_v8, %v631_v52  ;;  %v2219_v51 = vpop.permute.xlu1 %2218  ;;  %v1880_v27 = vpack.c.bf16 %v634_v15, %v632_v32  ;;  %1832 = vmatmul.mubr.msk.f32.gmra.mrb[2].mxu0 %vm510_vm7, %v2665_v28  ;;  %v2244_v20 = vpop.permute.xlu0 %2243  ;;  %v1306_v62 = vsel %vm1300_vm9, %v2150_v23, %v2151_v19  ;;  %v1886_v7 = vpack.c.bf16 %v2839_v43, %v757_v42  ;;  %v2263_v43 = vld [vmem:[#allocation2 + $0x18] sm:$0xff]  ;;  %v441_v52 = vld [vmem:[#allocation6 + $0x20] sm:$0xff] }
 0x1ac   : > { %v2221_v37 = vunpack.i.h.bf16 %v2219_v51  ;;  %v2220_v25 = vunpack.i.l.bf16 %v2219_v51  ;;  %1255 = vmatprep.mubr.f32.mxu0 %v2398_v1  ;;  %v1303_v53 = vsel %vm1300_vm9, %v2231_v46, %v2085_v9  ;;  %v763_v55 = vsel %vm756_vm10, %v2091_v57, %v2240_v33  ;;  %v442_v32 = vld [vmem:[#allocation6 + $0x28] sm:$0xff] }
 0x1ad   : > { %1881 = vmatprep.subr.bf16.mxu1 %v1880_v27  ;;  %v2246_v22 = vunpack.i.h.bf16 %v2244_v20  ;;  %v2245_v2 = vunpack.i.l.bf16 %v2244_v20  ;;  %v764_v9 = vsel %vm756_vm10, %v2240_v33, %v2241_v63 }
 0x1ae   : > { %v1177_v58 = vsel %vm1170_vm6, %v2221_v37, %v2140_v26  ;;  %v1175_v17 = vsel %vm1170_vm6, %v2220_v25, %v2135_v21  ;;  %1883 = vmatpush1.bf16.msra.mxu1 %v1882_v44  ;;  %v1301_v21 = vsel %vm1300_vm9, %v2230_v47, %v2145_v56  ;;  %v440_v56 = vld [vmem:[#allocation6 + $0x8] sm:$0xff] }
 0x1af   : > { %v1914_v36 = vpack.c.bf16 %v1177_v58, %v1175_v17  ;;  %v2234_v61 = vpop.permute.xlu1 %2233  ;;  %1885 = vmatprep.subr.bf16.mxu1 %v1884_v18  ;;  %v1918_v57 = vpack.c.bf16 %v1303_v53, %v1301_v21  ;;  %v729_v4 = vpop.permute.xlu0 %728  ;;  %v1307_v49 = vsel %vm1300_vm9, %v2246_v22, %v2155_v29  ;;  %v1305_v60 = vsel %vm1300_vm9, %v2245_v2, %v2150_v23 }
 0x1b0   : > { %v2236_v59 = vunpack.i.h.bf16 %v2234_v61  ;;  %v2235_v26 = vunpack.i.l.bf16 %v2234_v61  ;;  %v1922_v10 = vpack.c.bf16 %v1307_v49, %v1305_v60 }
 0x1b1   : > { %1825 = vmatmul.mubr.msk.f32.vlgmr.msra.gmra.mrb[0].mxu1 %vm510_vm7, %v2683_v34  ;;  %1915 = vmatpush1.bf16.msra.mxu0 %v1914_v36  ;;  %v1308_v34 = vsel %vm1300_vm9, %v2155_v29, %v2156_v38 }
 0x1b2   : > { %v761_v35 = vsel %vm756_vm10, %v2090_v41, %v2235_v26  ;;  %1887 = vmatpush1.bf16.msra.mxu1 %v1886_v7  ;;  %1917 = vmatprep.subr.bf16.mxu0 %v1916_v16  ;;  %v762_v48 = vsel %vm756_vm10, %v2235_v26, %v2236_v59  ;;  %v1920_v0 = vpack.c.bf16 %v1308_v34, %v1306_v62 }
 0x1b3   : > { %v1890_v3 = vpack.c.bf16 %v763_v55, %v761_v35  ;;  %v601_v54 = vpop.permute.xlu1 %600  ;;  %717 = vmatprep.mubr.f32.mxu1 %v2398_v1  ;;  %v1888_v40 = vpack.c.bf16 %v764_v9, %v762_v48  ;;  %v2419_v35 = vmov 0  }
 0x1b4   : > { %1833 = vmatmul.mubr.msk.f32.vlgmr.msra.gmra.mrb[0].mxu0 %vm510_vm7, %v2673_v30  ;;  %v731_v30 = vpop.permute.xlu0 %730  ;;  %2248 = vset.pattern.permute.xlu1 %v2419_v35 }
 0x1b5   : > { %1826 = vmatmul.mubr.msk.f32.gmra.mrb[2].mxu1 %vm510_vm7, %v601_v54  ;;  %1889 = vmatprep.subr.bf16.mxu1 %v1888_v40 }
 0x1b6   : > { %1919 = vmatpush1.bf16.msra.mxu0 %v1918_v57  ;;  %1891 = vmatpush1.bf16.msra.mxu1 %v1890_v3 }
 0x1b7   : > { %1921 = vmatprep.subr.bf16.mxu0 %v1920_v0  ;;  %v1145_v1 = vpop.permute.xlu1 %1144  ;;  %1261 = vmatprep.mubr.f32.mxu0 %v2263_v43 }
 0x1b8   : > { %841 = vmatprep.mubr.f32.mxu1 %v2263_v43  ;;  %1834 = vmatmul.mubr.msk.f32.gmra.mrb[2].mxu0 %vm510_vm7, %v1145_v1 }
 0x1b9   : > { %1827 = vmatmul.mubr.msk.f32.vlgmr.msra.gmra.mrb[0].mxu1 %vm510_vm7, %v729_v4  ;;  %1385 = vmatprep.mubr.f32.mxu0 %v2263_v43 }
 0x1ba   : > { %1923 = vmatpush1.bf16.msra.mxu0 %v1922_v10  ;;  %847 = vmatprep.mubr.f32.mxu1 %v2263_v43 }
 0x1bb   : > { %v1273_v11 = vpop.permute.xlu1 %1272  ;;  %2247 = vset.pattern.permute.xlu0 %v2419_v35 }
 0x1bd   : > { %1835 = vmatmul.mubr.msk.f32.vlgmr.msra.gmra.mrb[0].mxu0 %vm510_vm7, %v1273_v11  ;;  %1828 = vmatmul.mubr.msk.f32.gmra.mrb[2].mxu1 %vm510_vm7, %v731_v30 }
 0x1be   : > { %1391 = vmatprep.mubr.f32.mxu0 %v2263_v43 }
 0x1bf   : > { %v1275_v6 = vpop.permute.xlu1 %1274 }
 0x1c1   : > { %1836 = vmatmul.mubr.msk.f32.gmra.mrb[2].mxu0 %vm510_vm7, %v1275_v6 }
 0x1c3   : > { %v1421_v17 = vpop.permute.xlu1 %1420 }
 0x1c4   : > { %1858 = vmatprep.mubr.msk.f32.mxu1 %vm1430_vm12, %v1421_v17 }
 0x1c7   : > { %v1423_v36 = vpop.permute.xlu1 %1422 }
 0x1cb   : > { %v1425_v61 = vpop.permute.xlu1 %1424 }
 0x1cf   : > { %v1427_v16 = vpop.permute.xlu1 %1426 }
 0x1d3   : > { %v1516_v62 = vpop.permute.xlu1 %1515 }
 0x1d7   : > { %v1518_v2 = vpop.permute.xlu1 %1517 }
 0x1db   : > { %v1520_v48 = vpop.permute.xlu1 %1519 }
 0x1df   : > { %v1522_v9 = vpop.permute.xlu1 %1521 }
 0x28c   : > { %v843_v5 = vpop.f32.mrb[0].mxu1 }
 0x28d   : > { %v1928_v24 = vadd.f32 %v843_v5, %v439_v39  ;;  %v845_v12 = vpop.f32.mrb[1].mxu1 }
 0x28e   : > { %v1930_v41 = vadd.f32 %v845_v12, %v440_v56 }
 0x290   : > { %v1387_v13 = vpop.f32.mrb[0].mxu0  ;;  %v849_v14 = vpop.f32.mrb[2].mxu1 }
 0x291   : > { %v2902_v8 = vadd.f32 %v1928_v24, %v1387_v13  ;;  %v1932_v15 = vadd.f32 %v849_v14, %v441_v52  ;;  %v1389_v50 = vpop.f32.mrb[1].mxu0  ;;  %v851_v19 = vpop.f32.mrb[3].mxu1 }
 0x292   : > { %v2904_v23 = vadd.f32 %v1930_v41, %v1389_v50  ;;  %v1934_v44 = vadd.f32 %v851_v19, %v442_v32 }
 0x293   : > { %v1404_v51 = vrot.slane %v2902_v8, 4 }
 0x294   : > { %v1393_v27 = vpop.f32.mrb[2].mxu0  ;;  %v1405_v46 = vrot.slane %v2904_v23, 4 }
 0x295   : > { %v2908_v37 = vadd.f32 %v1932_v15, %v1393_v27  ;;  %v1408_v25 = vadd.f32 %v2902_v8, %v1404_v51  ;;  %v1395_v31 = vpop.f32.mrb[3].mxu0 }
 0x296   : > { %v2911_v42 = vadd.f32 %v1934_v44, %v1395_v31  ;;  %v1409_v47 = vadd.f32 %v2904_v23, %v1405_v46 }
 0x297   : > { %v1410_v33 = vadd.f32 %v2908_v37, %v1408_v25 }
 0x298   : > { %v1411_v18 = vadd.f32 %v2911_v42, %v1409_v47 }
 0x299   : > { %v1413_v38 = vsel %vm1412_vm11, %v1410_v33, 0.0 }
 0x29a   : > { %v1414_v63 = vsel %vm1412_vm11, %v1411_v18, 0.0 }
 0x29b   : > { %v1415_v58 = vadd.f32 %v1414_v63, %v1413_v38 }
 0x29d   : > { %1416 = vadd.xlane.f32.xlu0 %v1415_v58 }
 0x32a   : > { %v1417_v20 = vpop.xlane.xlu0 %1416 }
 0x32b   : > { %v1419_v29 = vmul.f32 0.00390625, %v1417_v20 }
 0x32d   : > { %1856 = vmatprep.subr.msk.mxu1 %vm1412_vm11, %v1419_v29 }
 0x32e   : > { %1857 = vmatpush3.msk.msra.mxu1 %vm1412_vm11, %v1419_v29 }
 0x32f   : > { %1859 = vmatmul.mubr.msk.f32.vlgmr.msra.gmra.mrb[4].mxu1 %vm1430_vm12, %v1423_v36 }
 0x330   : > { %1865 = vmatprep.mubr.msk.f32.mxu1 %vm1525_vm13, %v1516_v62 }
 0x402   : > { %v1860_v7 = vpop.f32.mrb[4].mxu1 }
 0x403   : > { %v1510_v53 = vadd.f32 %v1860_v7, %v1427_v16  ;;  %v1504_v59 = vpop.f32.mrb[5].mxu1 }
 0x404   : > { %v1505_v26 = vadd.f32 %v1504_v59, %v1425_v61 }
 0x405   : > { %v1514_v21 = vmax.f32 %v1510_v53, 0.0 }
 0x406   : > { %v1513_v55 = vmax.f32 %v1505_v26, 0.0 }
 0x408   : > { %v1924_v22 = vpack.c.bf16 %v1514_v21, %v1513_v55 }
 0x40a   : > { %1925 = vmatprep.subr.bf16.mxu1 %v1924_v22 }
 0x40b   : > { %1927 = vmatpush3.bf16.msra.mxu1 %v1924_v22 }
 0x40e   : > { %1866 = vmatmul.mubr.msk.f32.vlgmr.msra.gmra.mrb[6].mxu1 %vm1525_vm13, %v1518_v2 }
 0x4e1   : > { %v1867_v3 = vpop.f32.mrb[6].mxu1 }
 0x4e2   : > { %v1602_v45 = vadd.f32 %v1867_v3, %v1522_v9  ;;  %v1596_v28 = vpop.f32.mrb[7].mxu1 }
 0x4e3   : > { %v1597_v54 = vadd.f32 %v1596_v28, %v1520_v48 }
 0x4e4   : > { %v1648_v40 = vsel %vm1605_vm14, %v1602_v45, -inf }
 0x4e5   : > { %v1649_v57 = vrot.slane %v1648_v40, 4  ;;  %v1606_v34 = vsel %vm1605_vm14, %v1597_v54, -inf  ;;  %v1626_v4 = vsel %vm1625_vm15, %v1597_v54, -inf }
 0x4e6   : > { %v1607_v49 = vrot.slane %v1606_v34, 4  ;;  %v1627_v60 = vrot.slane %v1626_v4, 4 }
 0x4e7   : > { %v1650_v0 = vmax.f32 %v1648_v40, %v1649_v57 }
 0x4e8   : > { %v1608_v1 = vmax.f32 %v1606_v34, %v1607_v49  ;;  %v1628_v43 = vmax.f32 %v1626_v4, %v1627_v60 }
 0x4e9   : > { %v1651_v10 = vrot.slane %v1650_v0, 2 }
 0x4ea   : > { %v1609_v30 = vrot.slane %v1608_v1, 2  ;;  %v1629_v11 = vrot.slane %v1628_v43, 2 }
 0x4eb   : > { %v1652_v6 = vmax.f32 %v1650_v0, %v1651_v10 }
 0x4ec   : > { %v1610_v39 = vmax.f32 %v1608_v1, %v1609_v30  ;;  %v1630_v56 = vmax.f32 %v1628_v43, %v1629_v11 }
 0x4ed   : > { %v1653_v5 = vrot.slane %v1652_v6, 1 }
 0x4ee   : > { %v1611_v24 = vrot.slane %v1610_v39, 1  ;;  %v1631_v12 = vrot.slane %v1630_v56, 1 }
 0x4ef   : > { %v1654_v41 = vmax.f32 %v1652_v6, %v1653_v5 }
 0x4f0   : > { %v1612_v52 = vmax.f32 %v1610_v39, %v1611_v24  ;;  %v1632_v32 = vmax.f32 %v1630_v56, %v1631_v12 }
 0x4f1   : > { %v1655_v13 = vsub.f32 %v1602_v45, %v1654_v41 }
 0x4f2   : > { %v1613_v14 = vsub.f32 %v1597_v54, %v1612_v52  ;;  %v1633_v15 = vsub.f32 %v1597_v54, %v1632_v32 }
 0x4f3   : > { %v1656_v50 = vmul.f32 1.442695, %v1655_v13 }
 0x4f4   : > { %v1614_v19 = vmul.f32 1.442695, %v1613_v14  ;;  %v1634_v44 = vmul.f32 1.442695, %v1633_v15 }
 0x4f5   : > { %2251 = vpow2.f32 %v1656_v50 }
 0x4f6   : > { %2253 = vpow2.f32 %v1614_v19 }
 0x4f7   : > { %2255 = vpow2.f32 %v1634_v44 }
 0x4ff   : > { %v2252_v51 = vpop.eup %2251 }
 0x500   : > { %v2254_v27 = vpop.eup %2253  ;;  %v1658_v46 = vsel %vm1605_vm14, %v2252_v51, 0.0 }
 0x501   : > { %v2256_v25 = vpop.eup %2255  ;;  %v1659_v31 = vrot.slane %v1658_v46, 4  ;;  %v1616_v47 = vsel %vm1605_vm14, %v2254_v27, 0.0 }
 0x502   : > { %v1637_v33 = vrot.slane %v2256_v25, 4  ;;  %v1617_v18 = vrot.slane %v1616_v47, 4 }
 0x503   : > { %v1660_v38 = vadd.f32 %v1659_v31, %v1658_v46 }
 0x504   : > { %v1618_v63 = vadd.f32 %v1617_v18, %v1616_v47  ;;  %v1639_v58 = vsel %vm1605_vm14, %v1637_v33, 0.0 }
 0x505   : > { %v1661_v17 = vrot.slane %v1660_v38, 2  ;;  %v1640_v20 = vrot.slane %v1639_v58, 4 }
 0x506   : > { %v1619_v29 = vrot.slane %v1618_v63, 2 }
 0x507   : > { %v1641_v36 = vadd.f32 %v1640_v20, %v1639_v58  ;;  %v1662_v61 = vadd.f32 %v1661_v17, %v1660_v38 }
 0x508   : > { %v1620_v16 = vadd.f32 %v1619_v29, %v1618_v63 }
 0x509   : > { %v1642_v62 = vrot.slane %v1641_v36, 2  ;;  %v1663_v7 = vrot.slane %v1662_v61, 1 }
 0x50a   : > { %v1621_v53 = vrot.slane %v1620_v16, 1 }
 0x50b   : > { %v1643_v59 = vadd.f32 %v1642_v62, %v1641_v36  ;;  %v1664_v21 = vadd.f32 %v1663_v7, %v1662_v61 }
 0x50c   : > { %v1622_v26 = vadd.f32 %v1621_v53, %v1620_v16 }
 0x50d   : > { %v1644_v55 = vrot.slane %v1643_v59, 1 }
 0x50e   : > { %2257 = vrcp.f32 %v1622_v26 }
 0x50f   : > { %v1645_v22 = vadd.f32 %v1644_v55, %v1643_v59  ;;  %2259 = vrcp.f32 %v1664_v21 }
 0x511   : > { %2261 = vrcp.f32 %v1645_v22 }
 0x518   : > { %v2258_v2 = vpop.eup %2257 }
 0x519   : > { %v1624_v35 = vmul.f32 %v2258_v2, %v2254_v27  ;;  %v2260_v48 = vpop.eup %2259 }
 0x51a   : > { %v1666_v45 = vmul.f32 %v2260_v48, %v2252_v51 }
 0x51b   : > { %v2262_v9 = vpop.eup %2261  ;;  %1669 = vperm.xlu1 %2248, %v1624_v35  }
 0x51c   : > { %v1647_v3 = vmul.f32 %v2262_v9, %v2256_v25 }
 0x51e   : > { %1676 = vperm.xlu0 %2247, %v1647_v3  }
 0x51f   : > { %1691 = vperm.xlu1 %2248, %v1666_v45  }
 0x59a   : > { %v1670_v28 = vpop.permute.xlu1 %1669 }
 0x59b   : > { %v1672_v4 = vmul.f32 %v2902_v8, %v1670_v28  ;;  %v1673_v49 = vmul.f32 %v2904_v23, %v1670_v28 }
 0x59d   : > { %v1677_v54 = vpop.permute.xlu0 %1676 }
 0x59e   : > { %v1679_v40 = vmul.f32 %v2902_v8, %v1677_v54  ;;  %v1680_v57 = vmul.f32 %v2904_v23, %v1677_v54  ;;  %v1692_v34 = vpop.permute.xlu1 %1691 }
 0x59f   : > { %v1694_v10 = vmul.f32 %v2908_v37, %v1692_v34  ;;  %v1695_v30 = vmul.f32 %v2911_v42, %v1692_v34 }
 0x5a0   : > { %v1683_v60 = vrot.slane %v1679_v40, 4  ;;  %v1684_v0 = vrot.slane %v1680_v57, 4 }
 0x5a2   : > { %v1687_v1 = vadd.f32 %v1683_v60, %v1672_v4  ;;  %v1688_v43 = vadd.f32 %v1684_v0, %v1673_v49 }
 0x5a4   : > { %v1696_v11 = vadd.f32 %v1694_v10, %v1687_v1  ;;  %v1697_v6 = vadd.f32 %v1695_v30, %v1688_v43 }
 0x5a6   : > { %v1700_v39 = vcombine.low %v1696_v11, %v1697_v6 }
 0x5a8   : > { %1702 = vst [vmem:[%s174_s23] sm:$0xff] %v1700_v39 }
 0x5a9   : > { %2335 = shalt.err (!%p2332_p7)
}
 0x5aa   : > { %s2336_s20 = scalar_lea.hbm %s2943_s4, 128  ;;  %s2340_s25 = scalar_lea.hbm %s2989_s2, 256 }
 0x5ab   : > { %p2337_p9 = scmp.ne.s32.totalorder %s2943_s4, %s2336_s20  ;;  %p2341_p0 = scmp.lt.u32.totalorder %s2943_s4, %s2989_s2 }
 0x5ac   : > { %p2342_p11 = scmp.lt.u32.totalorder %s2340_s25, %s2336_s20  ;;  %p2344_p4 = scmp.lt.u32.totalorder %s2336_s20, %s2943_s4 }
 0x5ad   : > { %p2338_p2 = pnand %p2337_p9, %p2527_p12 }
 0x5ae   : > { %p2343_p1 = por %p2342_p11, %p2341_p0 }
 0x5af   : > { %p2339_p5 = pneg %p2338_p2 }
 0x5b0   : > { %p2345_p6 = por %p2344_p4, %p2343_p1 }
 0x5b2   : > { %p2346_p8 = pnand %p2345_p6, %p2339_p5 }
 0x5b4   : > { %2349 = shalt.err (!%p2346_p8)
}
 0x5b5   : > { %1962 = dma.vmem_to_hbm [thread:$0]  (%p2527_p12), %s2945_s28, 128, %s2943_s4, %s1704_s5  }
 0x5b6 PF: > { %s1730_s15 = sand.u32 1, %s2380_s9   ;;  %p3004_p10 = scmp.ne.s32.totalorder %s2994_s16, 0 }
 0x5b7   : > { %p3005_p13 = scmp.ge.s32.totalorder %s2392_s12, 2  ;;  %s1731_s17 = scalar_lea.sflag [#allocation5], %s1730_s15 }
 0x5b9   : > { %p1973_p3 = pnand %p3005_p13, %p3004_p10 }
 0x5bb   : > { %2375 = dma.done.wait (!%p1973_p3), %s1731_s17, 128  }
 0x5bc   : > { %2377 = vsyncadd (!%p1973_p3), %s1731_s17, 4294967168  ;;  %p16_p7 = scmp.ge.s32.totalorder %s2492_s21, 4   ;;  %s3006_s9 = smov %s2384_s10 }
 0x5bd   : > { %s3007_s10 = smov %s2388_s11  ;;  %s3008_s11 = smov %s2523_s8 }
 0x5be   : > { %s3009_s12 = smov %s2492_s21  ;;  %18 = sbr.rel (!%p16_p7) target bundleno = 6 (0x6), region = 77 }
 0x5c5   :  { %1736 = vsyncpa [#allocation4], 1 }
 0x5c6   :  { %1738 = vsyncpa [#allocation4 + $0x1], 1 }
 0x5c7   :  { %1739 = vsyncpa [#allocation7], 1 }
 0x5c8   :  { %1740 = vsyncpa [#allocation5], 1 }
 0x5c9   :  { %1742 = vsyncpa [#allocation5 + $0x1], 1 }

</bundles_post_ra>
